<compile_context>
chip_gen: v7x
topology: tpu7x:2x2x1
jax: 0.10.0
libtpu: 0.0.40
codegen_flags: <defaults>
</compile_context>

<pallas_src>
import math
import jax
import jax.numpy as jnp
from jax import lax
from jax.experimental import pallas as pl
from jax.experimental.pallas import tpu as pltpu


def _round_up(x, m):
    return (x + m - 1) // m * m


def _pick_tz(Z, desired):
    """Batch tile: multiple of 8, <= desired, divides the 8-padded batch
    exactly (no full-tile padding / output slice), and leaves >= 2 grid steps
    so both v7x TensorCores get work whenever the batch allows it."""
    zr = _round_up(Z, 8)
    cap = min(desired, zr // 2) if zr >= 16 else zr
    cap = max(8, cap - cap % 8)
    for t in range(cap, 7, -8):
        if zr % t == 0:
            return t, zr
    return 8, zr


def multilinear2_kernel(x1_ref, x2_ref, w_ref, b_ref, o_ref, g_ref):
    # x1: (TZ, A) f32, x2: (TZ, B) f32, w: (A*B, O) bf16, b: (1, O) f32,
    # o: (TZ, O), g scratch: (TZ, A*B) bf16 with g[z, a*B+b] = x1[z,a]*x2[z,b].
    A = x1_ref.shape[1]
    B = x2_ref.shape[1]

    # Build the rank-1 feature products into adjacent 128-lane-aligned slabs
    # of the scratch.  A is small -> static unroll.  Re-read x2 / the x1
    # column from VMEM each step (don't hoist whole-tile values) so vreg
    # pressure stays bounded at large TZ.  Multiply in f32 on the VPU (v5e
    # has no bf16 VALU), cast to bf16 only on the store.
    for a in range(A):
        g_ref[:, a * B:(a + 1) * B] = (
            x1_ref[:, a:a + 1] * x2_ref[...]).astype(g_ref.dtype)

    # Single native-bf16 MXU contraction over K = A*B with f32 accumulation.
    acc = lax.dot_general(
        g_ref[...], w_ref[...],
        dimension_numbers=(((1,), (0,)), ((), ())),
        preferred_element_type=jnp.float32)
    o_ref[...] = (acc + b_ref[...]).astype(o_ref.dtype)


def multilinear(x1, x2, weight, bias, *, tz=512):
    """out = einsum('cab,za,zb->zc', weight, x1, x2) + bias via a Pallas kernel."""
    Z, A = x1.shape
    Z2, B = x2.shape
    assert Z2 == Z
    O = weight.shape[0]
    assert weight.shape == (O, A, B)
    K = A * B

    # HBM-side re-layouts (cheap relative to the kernel):
    #   weight (O, A, B) -> (A*B, O) bf16   so w2[a*B+b, o] = weight[o, a, b]
    #   bias   (O,)      -> (1, O)   f32    lane-friendly 2-D broadcast
    w2 = jnp.transpose(weight, (1, 2, 0)).reshape(K, O).astype(jnp.bfloat16)
    b2 = bias.astype(jnp.float32).reshape(1, O)

    tz, zp = _pick_tz(Z, tz)
    if zp != Z:  # only when Z % 8 != 0: pad at most 7 rows
        x1 = jnp.pad(x1, ((0, zp - Z), (0, 0)))
        x2 = jnp.pad(x2, ((0, zp - Z), (0, 0)))

    x_bytes = jnp.dtype(x1.dtype).itemsize
    cost = pl.CostEstimate(
        flops=2 * zp * K * O + zp * O,
        transcendentals=0,
        bytes_accessed=(zp * A + zp * B + zp * O) * x_bytes + K * O * 2 + O * 4)

    out = pl.pallas_call(
        multilinear2_kernel,
        out_shape=jax.ShapeDtypeStruct((zp, O), x1.dtype),
        grid=(zp // tz,),
        in_specs=[
            pl.BlockSpec((tz, A), lambda i: (i, 0)),   # x1 tile, pipelined over Z
            pl.BlockSpec((tz, B), lambda i: (i, 0)),   # x2 tile, pipelined over Z
            pl.BlockSpec((K, O), lambda i: (0, 0)),    # bf16 weight, VMEM-resident
            pl.BlockSpec((1, O), lambda i: (0, 0)),    # bias, VMEM-resident
        ],
        out_specs=pl.BlockSpec((tz, O), lambda i: (i, 0)),
        scratch_shapes=[pltpu.VMEM((tz, K), jnp.bfloat16)],
        compiler_params=pltpu.CompilerParams(
            dimension_semantics=("parallel",)),        # Z tiles shard across TCs on v7x
        cost_estimate=cost,
    )(x1, x2, w2, b2)
    return out if zp == Z else out[:Z]


if __name__ == "__main__":
    # Module hyper-params: in_features=(4, 128), out_features=128.
    in_features = (4, 128)
    out_features = 128
    Z = 512  # batch: 8-aligned, gives tz=256 and a 2-step parallel grid

    # Deterministic init matching reset_parameters(): U(-bound, bound),
    # bound = 1 / sqrt(max(in_features)).
    bound = 1.0 / math.sqrt(max(in_features))
    key = jax.random.PRNGKey(0)
    kw, kb, k1, k2 = jax.random.split(key, 4)
    weight = jax.random.uniform(kw, (out_features,) + in_features,
                                jnp.float32, -bound, bound)
    bias = jax.random.uniform(kb, (out_features,), jnp.float32, -bound, bound)

    x1 = jax.random.normal(k1, (Z, in_features[0]), jnp.float32)
    x2 = jax.random.normal(k2, (Z, in_features[1]), jnp.float32)

    out = jax.block_until_ready(multilinear(x1, x2, weight, bias))
    assert out.shape == (Z, out_features)

    # 1) Full-precision reference (same einsum the PyTorch module builds for
    #    n=2), at a tolerance appropriate for one bf16 rounding of the
    #    products/weights with f32 accumulation.
    ref = jnp.einsum('cab,za,zb->zc', weight, x1, x2) + bias
    assert jnp.allclose(out, ref, atol=5e-2, rtol=5e-2), "mismatch vs f32 einsum reference"

    # 2) Reference with the kernel's exact quantization (bf16 products and
    #    weights, f32 accumulate) at tight tolerance — validates the kernel
    #    plumbing independently of the bf16 rounding.
    g = (x1[:, :, None] * x2[:, None, :]).reshape(Z, -1)
    g = g.astype(jnp.bfloat16).astype(jnp.float32)
    wq = jnp.transpose(weight, (1, 2, 0)).reshape(-1, out_features)
    wq = wq.astype(jnp.bfloat16).astype(jnp.float32)
    ref_q = g @ wq + bias
    assert jnp.allclose(out, ref_q, atol=1e-3, rtol=1e-3), "mismatch vs bf16-quantized reference"

    print("KERNEL_OK")
</pallas_src>

<mosaic_0001>
module attributes {stable_mosaic.version = 11 : i64} {
  func.func @multilinear2_kernel(%arg0: i32, %arg1: memref<256x4xf32, #tpu.memory_space<vmem>>, %arg2: memref<256x128xf32, #tpu.memory_space<vmem>>, %arg3: memref<512x128xbf16, #tpu.memory_space<vmem>>, %arg4: memref<1x128xf32, #tpu.memory_space<vmem>>, %arg5: memref<256x128xf32, #tpu.memory_space<vmem>>, %arg6: memref<256x512xbf16, #tpu.memory_space<vmem>>) attributes {dimension_semantics = [#tpu.dimension_semantics<parallel>], iteration_bounds = array<i64: 2>, scalar_prefetch = 0 : i64, scratch_operands = 1 : i64, tpu.core_type = #tpu.core_type<tc>, window_params = [{transform_indices = @transform_0, window_bounds = array<i64: 256, 4>}, {transform_indices = @transform_1, window_bounds = array<i64: 256, 128>}, {pipeline_mode = #tpu.pipeline_mode<synchronous>, transform_indices = @transform_2, window_bounds = array<i64: 512, 128>}, {pipeline_mode = #tpu.pipeline_mode<synchronous>, transform_indices = @transform_3, window_bounds = array<i64: 1, 128>}, {transform_indices = @transform_4, window_bounds = array<i64: 256, 128>}]} {
    %c0 = arith.constant 0 : index
    %c0_0 = arith.constant 0 : index
    %0 = vector.load %arg1[%c0, %c0_0] : memref<256x4xf32, #tpu.memory_space<vmem>>, vector<256x1xf32>
    %c0_1 = arith.constant 0 : index
    %c0_2 = arith.constant 0 : index
    %1 = vector.load %arg2[%c0_1, %c0_2] : memref<256x128xf32, #tpu.memory_space<vmem>>, vector<256x128xf32>
    %2 = vector.broadcast %0 : vector<256x1xf32> to vector<256x128xf32>
    %3 = arith.mulf %2, %1 : vector<256x128xf32>
    %4 = arith.truncf %3 : vector<256x128xf32> to vector<256x128xbf16>
    %c0_3 = arith.constant 0 : index
    %c0_4 = arith.constant 0 : index
    %5 = vector.load %arg6[%c0_3, %c0_4] : memref<256x512xbf16, #tpu.memory_space<vmem>>, vector<256x128xbf16>
    tpu.vector_store %arg6[%c0_3, %c0_4], %4 {strides = array<i32>} : memref<256x512xbf16, #tpu.memory_space<vmem>>, vector<256x128xbf16>,
    %c0_5 = arith.constant 0 : index
    %c1 = arith.constant 1 : index
    %6 = vector.load %arg1[%c0_5, %c1] : memref<256x4xf32, #tpu.memory_space<vmem>>, vector<256x1xf32>
    %c0_6 = arith.constant 0 : index
    %c0_7 = arith.constant 0 : index
    %7 = vector.load %arg2[%c0_6, %c0_7] : memref<256x128xf32, #tpu.memory_space<vmem>>, vector<256x128xf32>
    %8 = vector.broadcast %6 : vector<256x1xf32> to vector<256x128xf32>
    %9 = arith.mulf %8, %7 : vector<256x128xf32>
    %10 = arith.truncf %9 : vector<256x128xf32> to vector<256x128xbf16>
    %c0_8 = arith.constant 0 : index
    %c128 = arith.constant 128 : index
    %11 = vector.load %arg6[%c0_8, %c128] : memref<256x512xbf16, #tpu.memory_space<vmem>>, vector<256x128xbf16>
    tpu.vector_store %arg6[%c0_8, %c128], %10 {strides = array<i32>} : memref<256x512xbf16, #tpu.memory_space<vmem>>, vector<256x128xbf16>,
    %c0_9 = arith.constant 0 : index
    %c2 = arith.constant 2 : index
    %12 = vector.load %arg1[%c0_9, %c2] : memref<256x4xf32, #tpu.memory_space<vmem>>, vector<256x1xf32>
    %c0_10 = arith.constant 0 : index
    %c0_11 = arith.constant 0 : index
    %13 = vector.load %arg2[%c0_10, %c0_11] : memref<256x128xf32, #tpu.memory_space<vmem>>, vector<256x128xf32>
    %14 = vector.broadcast %12 : vector<256x1xf32> to vector<256x128xf32>
    %15 = arith.mulf %14, %13 : vector<256x128xf32>
    %16 = arith.truncf %15 : vector<256x128xf32> to vector<256x128xbf16>
    %c0_12 = arith.constant 0 : index
    %c256 = arith.constant 256 : index
    %17 = vector.load %arg6[%c0_12, %c256] : memref<256x512xbf16, #tpu.memory_space<vmem>>, vector<256x128xbf16>
    tpu.vector_store %arg6[%c0_12, %c256], %16 {strides = array<i32>} : memref<256x512xbf16, #tpu.memory_space<vmem>>, vector<256x128xbf16>,
    %c0_13 = arith.constant 0 : index
    %c3 = arith.constant 3 : index
    %18 = vector.load %arg1[%c0_13, %c3] : memref<256x4xf32, #tpu.memory_space<vmem>>, vector<256x1xf32>
    %c0_14 = arith.constant 0 : index
    %c0_15 = arith.constant 0 : index
    %19 = vector.load %arg2[%c0_14, %c0_15] : memref<256x128xf32, #tpu.memory_space<vmem>>, vector<256x128xf32>
    %20 = vector.broadcast %18 : vector<256x1xf32> to vector<256x128xf32>
    %21 = arith.mulf %20, %19 : vector<256x128xf32>
    %22 = arith.truncf %21 : vector<256x128xf32> to vector<256x128xbf16>
    %c0_16 = arith.constant 0 : index
    %c384 = arith.constant 384 : index
    %23 = vector.load %arg6[%c0_16, %c384] : memref<256x512xbf16, #tpu.memory_space<vmem>>, vector<256x128xbf16>
    tpu.vector_store %arg6[%c0_16, %c384], %22 {strides = array<i32>} : memref<256x512xbf16, #tpu.memory_space<vmem>>, vector<256x128xbf16>,
    %c0_17 = arith.constant 0 : index
    %c0_18 = arith.constant 0 : index
    %24 = vector.load %arg6[%c0_17, %c0_18] : memref<256x512xbf16, #tpu.memory_space<vmem>>, vector<256x512xbf16>
    %c0_19 = arith.constant 0 : index
    %c0_20 = arith.constant 0 : index
    %25 = vector.load %arg3[%c0_19, %c0_20] : memref<512x128xbf16, #tpu.memory_space<vmem>>, vector<512x128xbf16>
    %cst = arith.constant dense<0.000000e+00> : vector<256x128xf32>
    %26 = tpu.matmul %24, %25, %cst {dimension_numbers = #tpu.dot_dimension_numbers<[1], [0], [0], [1], [0, 0, 1, 1], [], []>} : vector<256x512xbf16>, vector<512x128xbf16>, vector<256x128xf32> -> vector<256x128xf32>
    %c0_21 = arith.constant 0 : index
    %c0_22 = arith.constant 0 : index
    %27 = vector.load %arg4[%c0_21, %c0_22] : memref<1x128xf32, #tpu.memory_space<vmem>>, vector<1x128xf32>
    %28 = vector.broadcast %27 : vector<1x128xf32> to vector<256x128xf32>
    %29 = arith.addf %26, %28 : vector<256x128xf32>
    %c0_23 = arith.constant 0 : index
    %c0_24 = arith.constant 0 : index
    %30 = vector.load %arg5[%c0_23, %c0_24] : memref<256x128xf32, #tpu.memory_space<vmem>>, vector<256x128xf32>
    tpu.vector_store %arg5[%c0_23, %c0_24], %29 {strides = array<i32>} : memref<256x128xf32, #tpu.memory_space<vmem>>, vector<256x128xf32>,
    return
  }
  func.func @transform_0(%arg0: i32) -> (i32, i32) {
    %c0_i32 = arith.constant 0 : i32
    %c0_i32_0 = arith.constant 0 : i32
    return %arg0, %c0_i32 : i32, i32
  }
  func.func @transform_1(%arg0: i32) -> (i32, i32) {
    %c0_i32 = arith.constant 0 : i32
    %c0_i32_0 = arith.constant 0 : i32
    return %arg0, %c0_i32 : i32, i32
  }
  func.func @transform_2(%arg0: i32) -> (i32, i32) {
    %c0_i32 = arith.constant 0 : i32
    %c0_i32_0 = arith.constant 0 : i32
    %c0_i32_1 = arith.constant 0 : i32
    return %c0_i32, %c0_i32_0 : i32, i32
  }
  func.func @transform_3(%arg0: i32) -> (i32, i32) {
    %c0_i32 = arith.constant 0 : i32
    %c0_i32_0 = arith.constant 0 : i32
    %c0_i32_1 = arith.constant 0 : i32
    return %c0_i32, %c0_i32_0 : i32, i32
  }
  func.func @transform_4(%arg0: i32) -> (i32, i32) {
    %c0_i32 = arith.constant 0 : i32
    %c0_i32_0 = arith.constant 0 : i32
    return %arg0, %c0_i32 : i32, i32
  }
}

</mosaic_0001>

<bundles_post_ra>
// kernel: tpu_custom_call.1
= control target key start
LH: loop header
LB: loop body
LE: loop exit
PB: predicated region body
PF: predicated region fallthrough
CT: control target
= control target key end

     0   :  { %9 = vsyncpa [#allocation4], 0  ;;  %s3396_s0 = inlined_call_operand.vmem [shape: f32[512,4], index: 0, kind: input, shape index: {}]   ;;  %s3397_s1 = inlined_call_operand.vmem [shape: f32[512,128], index: 1, kind: input, shape index: {}]   ;;  %s3398_s2 = inlined_call_operand.hbm [shape: bf16[512,128], index: 2, kind: input, shape index: {}]   ;;  %s3399_s3 = inlined_call_operand.vmem [shape: f32[1,128], index: 3, kind: input, shape index: {}]   ;;  %s3400_s4 = inlined_call_operand.hbm [shape: f32[512,128], index: 4, kind: output, shape index: {}]  }
   0x1   :  { %10 = vsyncpa [#allocation5], 0 }
   0x2   :  { %12 = vsyncpa [#allocation5 + $0x1], 0  ;;  %s2726_s15 = smov 0   ;;  %s2728_s16 = smov 0  }
   0x3   :  { %s2730_s17 = smov 0   ;;  %s2732_s18 = smov 0  }
   0x4 LB: > { %s2747_s19 = sadd.s32 4294967295, %s2689_s18   ;;  %s2170_s20 = sadd.s32 4294967294, %s2689_s18   ;;  %s2689_s18 = sphi %s2732_s18, %s3419_s18   ;;  %s2685_s17 = sphi %s2730_s17, %s3418_s17   ;;  %s2681_s16 = sphi %s2728_s16, %s3417_s16   ;;  %s2677_s15 = sphi %s2726_s15, %s3416_s15  }
   0x5   : > { %s2751_s21 = sadd.s32 1, %s2689_s18   ;;  %s119_s22 = sadd.s32 1, %s2685_s17 }
   0x6   : > { %s116_s23 = ssub.s32 %s2689_s18, %s2751_s21  ;;  %p129_p0 = scmp.ne.s32.totalorder %s2685_s17, %s2681_s16 }
   0x7   : > { %p117_p1 = scmp.eq.s32.totalorder %s116_s23, 0  ;;  %p130_p2 = scmp.eq.s32.totalorder %s2747_s19, 1 }
   0x8   : > { %p135_p3 = scmp.ne.s32.totalorder %s2681_s16, %s2677_s15  ;;  %p136_p4 = scmp.eq.s32.totalorder %s2170_s20, 1 }
   0x9   : > { %s2762_s24 = scalar_select %p117_p1, %s2685_s17, %s119_s22  }
   0xa   : > { %p2764_p5 = por %p130_p2, %p129_p0  ;;  %p2768_p6 = por %p136_p4, %p135_p3 }
   0xb   : > { %p2171_p7 = scmp.ge.s32.totalorder %s2689_s18, 1  ;;  %p143_p8 = scmp.lt.s32.totalorder %s2689_s18, 3 }
   0xc   : > { %s3406_s25 = scalar_select %p2764_p5, 1, 0 }
   0xd   : > { %s3407_s26 = scalar_select %p2768_p6, 1, 0 }
   0xe   : > { %p3401_p9 = scmp.eq.s32.totalorder %s2747_s19, 0  ;;  %p2775_p10 = pnand %p2171_p7, %p143_p8 }
   0xf   : > { %s2691_s28 = smov [#allocation3]   ;;  %s2595_s7 = scalar_lea.hbm %s3398_s2, 4096 }
  0x10   : > { %s3408_s27 = scalar_select %p2775_p10, 1, 0 }
  0x11   : > { %s155_s29 = sshll.u32 %s2691_s28, 4  ;;  %p2450_p11 = pneg %p2775_p10  ;;  %s156_s29 = int_to_ptr.vmem [resolvable:$true] %s155_s29 }
  0x12   : > { %p2596_p13 = scmp.ne.s32.totalorder %s3398_s2, %s2595_s7  ;;  %p2602_p3 = scmp.lt.u32.totalorder %s2595_s7, %s3398_s2 }
  0x13   : > { %p2783_p12 = pnand %p3401_p9, %p2450_p11 }
  0x15   : > { %p2597_p0 = pneg %p2783_p12 }
  0x17   : > { %p2598_p1 = pnand %p2597_p0, %p2596_p13 }
  0x19   : > { %p2599_p2 = pneg %p2598_p1 }
  0x1b   : > { %p2604_p4 = pnand %p2602_p3, %p2599_p2 }
  0x1d   : > { %2607 = shalt.err (!%p2604_p4)
}
  0x1e   : > { %s2608_s12 = scalar_lea.vmem %s156_s29, 4096  ;;  %p2616_p9 = scmp.lt.s32.totalorder %s156_s29, %s156_s29 }
  0x1f   : > { %p2609_p7 = scmp.ne.s32.totalorder %s156_s29, %s2608_s12  ;;  %p2617_p6 = scmp.lt.s32.totalorder %s2608_s12, %s2608_s12 }
  0x21   : > { %p2611_p8 = pnand %p2609_p7, %p2597_p0  ;;  %p2618_p5 = por %p2617_p6, %p2616_p9 }
  0x23   : > { %p2612_p11 = pneg %p2611_p8 }
  0x25   : > { %p2619_p10 = pnand %p2618_p5, %p2612_p11 }
  0x27   : > { %2622 = shalt.err (!%p2619_p10)
}
  0x28   : > { %s2692_s13 = smov 64   ;;  %s2693_s14 = smov 4  }
  0x29   : > { %2453 = dma.hbm_to_vmem [thread:$0]  (!%p2783_p12), %s3398_s2, 4096, %s156_s29, [#allocation4], %s2692_s13, %s2692_s13, %s2693_s14  }
  0x2a   : > { %p3410_p13 = scmp.ne.s32.totalorder %s3408_s27, 0 }
  0x2b   : > { %p3411_p1 = scmp.eq.s32.totalorder (!%p3410_p13), %s2747_s19, 0 }
  0x2c   : > { %192 = sbr.rel (%p3410_p13) target bundleno = 797 (0x31d), region = 36 }
  0x33   : > { %2668 = dma.done.wait (%p3411_p1), [#allocation4], 4096   ;;  %p3412_p0 = pmov %p3411_p1 }
  0x34   : > { %s2177_s23 = sshll.u32 %s2747_s19, 5  ;;  %v2694_v0 = vmov 1   ;;  %v3404_v1 = vmov 0   ;;  %v2696_v12 = vmov 2   ;;  %v2563_v15 = vld [vmem:[#allocation3 + $0xc0] sm:$0xff]   ;;  %v2565_v19 = vld [vmem:[#allocation3 + $0xc8] sm:$0xff]  }
  0x35   : > { %2670 = vsyncadd (%p3412_p0), [#allocation4], 4294963200  ;;  %2504 = vset.pattern.permute.xlu0 %v2694_v0  ;;  %2502 = vset.pattern.permute.xlu1 %v3404_v1  ;;  %p224_p5 = scmp.lt.s32.totalorder %s2177_s23, 63  ;;  %v2564_v17 = vld [vmem:[#allocation3 + $0x80] sm:$0xff]   ;;  %v2566_v21 = vld [vmem:[#allocation3 + $0x88] sm:$0xff]   ;;  %v2697_v33 = vmov 3  }
  0x36   : > { %2332 = vmatprep.subr.bf16.mxu1 %v2563_v15  ;;  %v2567_v23 = vld [vmem:[#allocation3 + $0xd0] sm:$0xff]   ;;  %v2569_v26 = vld [vmem:[#allocation3 + $0xd8] sm:$0xff]   ;;  %v2571_v29 = vld [vmem:[#allocation3 + $0xe0] sm:$0xff]   ;;  %s220_s8 = sand.u32 1, %s2681_s16   ;;  %s2219_s13 = sshll.u32 %s2747_s19, 12 }
  0x37   : > { %s3421_s23 = smov (!%p224_p5, %s2177_s23), 63  ;;  %2333 = vmatpush3.bf16.msra.mxu1 %v2564_v17  ;;  %v2568_v25 = vld [vmem:[#allocation3 + $0x90] sm:$0xff]   ;;  %v2570_v27 = vld [vmem:[#allocation3 + $0x98] sm:$0xff]   ;;  %v2572_v30 = vld [vmem:[#allocation3 + $0xa0] sm:$0xff]   ;;  %s2176_s11 = sshll.u32 %s220_s8, 8 }
  0x38   : > { %s2178_s27 = sshll.u32 %s3421_s23, 3  ;;  %2334 = vmatprep.subr.bf16.mxu1 %v2565_v19  ;;  %v2573_v32 = vld [vmem:[#allocation3 + $0x40] sm:$0xff]   ;;  %v2575_v35 = vld [vmem:[#allocation3 + $0xe8] sm:$0xff]   ;;  %v2579_v40 = vld [vmem:[#allocation3 + $0xf0] sm:$0xff]   ;;  %s3272_s12 = scalar_lea.vmem [#allocation6], %s2176_s11 }
  0x39   : > { %s2820_s30 = scalar_lea.vmem %s3396_s0, %s2178_s27  ;;  %v2574_v34 = vld [vmem:[#allocation3] sm:$0xff]   ;;  %2220 = vmatprep.subr.bf16.mxu0 %v2573_v32  ;;  %v2576_v37 = vld [vmem:[#allocation3 + $0xa8] sm:$0xff]   ;;  %v2580_v42 = vld [vmem:[#allocation3 + $0xb0] sm:$0xff]   ;;  %s3058_s7 = scalar_lea.vmem %s3397_s1, %s2178_s27 }
  0x3a   : > { %v2823_v2 = vld [vmem:[%s2820_s30 + $0x8] sm:$0xff]  ;;  %v2826_v3 = vld [vmem:[%s2820_s30 + $0x10] sm:$0xff]  ;;  %v2831_v4 = vld [vmem:[%s2820_s30 + $0x18] sm:$0xff]  ;;  %2221 = vmatpush3.bf16.msra.mxu0 %v2574_v34  ;;  %s2084_s14 = sshll.u32 %s3272_s12, 4  ;;  %s3347_s23 = scalar_lea.hbm %s3400_s4, %s2219_s13  ;;  %s3349_s14 = int_to_ptr.vmem [resolvable:$true] %s2084_s14 }
  0x3b   : > { %596 = vperm.xlu0 %2504, %v2823_v2   ;;  %313 = vperm.xlu1 %2502, %v2826_v3   ;;  %v2836_v5 = vld [vmem:[%s2820_s30 + $0x28] sm:$0xff]  ;;  %v2841_v6 = vld [vmem:[%s2820_s30 + $0x38] sm:$0xff]  ;;  %v2864_v11 = vld [vmem:[%s2820_s30] sm:$0xff]  ;;  %s3355_s19 = scalar_lea.sflag [#allocation5], %s220_s8  ;;  %s2623_s27 = scalar_lea.vmem %s3349_s14, 4096 }
  0x3c   : > { %v2844_v7 = vld [vmem:[%s2820_s30 + $0x48] sm:$0xff]  ;;  %v2851_v8 = vld [vmem:[%s2820_s30 + $0x58] sm:$0xff]  ;;  %v2878_v16 = vld [vmem:[%s2820_s30 + $0x20] sm:$0xff]  ;;  %2335 = vmatpush3.bf16.msra.mxu1 %v2566_v21  ;;  %p2624_p6 = scmp.ne.s32.totalorder %s3349_s14, %s2623_s27  ;;  %p3414_p9 = scmp.ne.s32.totalorder %s3406_s25, 0 }
  0x3d   : > { %v2856_v9 = vld [vmem:[%s2820_s30 + $0x68] sm:$0xff]  ;;  %v2859_v10 = vld [vmem:[%s2820_s30 + $0x78] sm:$0xff]  ;;  %v2886_v20 = vld [vmem:[%s2820_s30 + $0x30] sm:$0xff]  ;;  %2336 = vmatprep.subr.bf16.mxu1 %v2567_v23  ;;  %s2698_s28 = smov [#allocation6]  }
  0x3e   : > { %v2869_v13 = vld [vmem:[%s2820_s30 + $0x88] sm:$0xff]  ;;  %v2875_v14 = vld [vmem:[%s2820_s30 + $0x98] sm:$0xff]  ;;  %v2892_v24 = vld [vmem:[%s2820_s30 + $0x40] sm:$0xff]  ;;  %p2625_p10 = pnand %p2624_p6, %p3414_p9  ;;  %s2627_s29 = sshll.u32 %s2698_s28, 4  ;;  %s2628_s29 = int_to_ptr.vmem [resolvable:$false] %s2627_s29 }
  0x3f   : > { %606 = vperm.xlu0 %2504, %v2831_v4   ;;  %318 = vperm.xlu1 %2502, %v2831_v4   ;;  %v2883_v18 = vld [vmem:[%s2820_s30 + $0xa8] sm:$0xff]  ;;  %v260_v22 = vld [vmem:[%s2820_s30 + $0xb8] sm:$0xff]  ;;  %v2896_v28 = vld [vmem:[%s2820_s30 + $0x50] sm:$0xff]  ;;  %p2630_p2 = scmp.lt.s32.totalorder %s3349_s14, %s2628_s29 }
  0x40   : > { %2337 = vmatpush3.bf16.msra.mxu1 %v2568_v25  ;;  %v2902_v31 = vld [vmem:[%s2820_s30 + $0x60] sm:$0xff]  ;;  %v2908_v36 = vld [vmem:[%s2820_s30 + $0x70] sm:$0xff]  ;;  %v2577_v38 = vld [vmem:[#allocation3 + $0x48] sm:$0xff]   ;;  %p2626_p12 = pneg %p2625_p10 }
  0x41   : > { %2338 = vmatprep.subr.bf16.mxu1 %v2569_v26  ;;  %v2578_v39 = vld [vmem:[#allocation3 + $0x8] sm:$0xff]   ;;  %v2913_v41 = vld [vmem:[%s2820_s30 + $0x80] sm:$0xff]  ;;  %2222 = vmatprep.subr.bf16.mxu0 %v2577_v38  ;;  %v2581_v43 = vld [vmem:[#allocation3 + $0x50] sm:$0xff]  }
  0x42   : > { %2223 = vmatpush3.bf16.msra.mxu0 %v2578_v39  ;;  %v2582_v44 = vld [vmem:[#allocation3 + $0x10] sm:$0xff]   ;;  %v2583_v45 = vld [vmem:[#allocation3 + $0xf8] sm:$0xff]   ;;  %v2923_v50 = vld [vmem:[%s2820_s30 + $0xa0] sm:$0xff] }
  0x43   : > { %616 = vperm.xlu0 %2504, %v2836_v5   ;;  %328 = vperm.xlu1 %2502, %v2836_v5   ;;  %v2918_v46 = vld [vmem:[%s2820_s30 + $0x90] sm:$0xff]  ;;  %v2584_v47 = vld [vmem:[#allocation3 + $0xb8] sm:$0xff]   ;;  %v2587_v51 = vld [vmem:[#allocation3 + $0x60] sm:$0xff]  }
  0x44   : > { %2339 = vmatpush3.bf16.msra.mxu1 %v2570_v27  ;;  %2224 = vmatprep.subr.bf16.mxu0 %v2581_v43  ;;  %v2585_v48 = vld [vmem:[#allocation3 + $0x58] sm:$0xff]   ;;  %v2588_v52 = vld [vmem:[#allocation3 + $0x20] sm:$0xff]   ;;  %v2929_v53 = vld [vmem:[%s2820_s30 + $0xb0] sm:$0xff] }
  0x45   : > { %2340 = vmatprep.subr.bf16.mxu1 %v2571_v29  ;;  %v2586_v49 = vld [vmem:[#allocation3 + $0x18] sm:$0xff]   ;;  %v2589_v54 = vld [vmem:[#allocation3 + $0x68] sm:$0xff]   ;;  %v2591_v56 = vld [vmem:[#allocation3 + $0x70] sm:$0xff]  }
  0x46   : > { %2225 = vmatpush3.bf16.msra.mxu0 %v2582_v44  ;;  %v2590_v55 = vld [vmem:[#allocation3 + $0x28] sm:$0xff]   ;;  %v2592_v57 = vld [vmem:[#allocation3 + $0x30] sm:$0xff]   ;;  %v2593_v58 = vld [vmem:[#allocation3 + $0x78] sm:$0xff]  }
  0x47   : > { %626 = vperm.xlu0 %2504, %v2841_v6   ;;  %338 = vperm.xlu1 %2502, %v2841_v6   ;;  %v2594_v59 = vld [vmem:[#allocation3 + $0x38] sm:$0xff]   ;;  %v2965_v60 = vld [vmem:[%s2820_s30 + $0xc0] sm:$0xff]  ;;  %v3036_v27 = vld [vmem:[%s2820_s30 + $0xe8] sm:$0xff] }
  0x48   : > { %2341 = vmatpush3.bf16.msra.mxu1 %v2572_v30  ;;  %2226 = vmatprep.subr.bf16.mxu0 %v2585_v48  ;;  %v2973_v63 = vld [vmem:[%s2820_s30 + $0xd8] sm:$0xff]  ;;  %v3063_v34 = vld [vmem:[%s3058_s7 + $0x8] sm:$0xff] }
  0x49   : > { %2342 = vmatprep.subr.bf16.mxu1 %v2575_v35  ;;  %v3010_v19 = vld [vmem:[%s2820_s30 + $0xb8] sm:$0xff] }
  0x4a   : > { %2227 = vmatpush3.bf16.msra.mxu0 %v2586_v49 }
  0x4b   : > { %636 = vperm.xlu0 %2504, %v2844_v7   ;;  %348 = vperm.xlu1 %2502, %v2844_v7  }
  0x4c   : > { %2343 = vmatpush3.bf16.msra.mxu1 %v2576_v37  ;;  %2228 = vmatprep.subr.bf16.mxu0 %v2587_v51 }
  0x4d   : > { %2344 = vmatprep.subr.bf16.mxu1 %v2579_v40 }
  0x4e   : > { %2229 = vmatpush3.bf16.msra.mxu0 %v2588_v52 }
  0x4f   : > { %646 = vperm.xlu0 %2504, %v2851_v8   ;;  %358 = vperm.xlu1 %2502, %v2851_v8  }
  0x50   : > { %2345 = vmatpush3.bf16.msra.mxu1 %v2580_v42  ;;  %2230 = vmatprep.subr.bf16.mxu0 %v2589_v54 }
  0x51   : > { %2346 = vmatprep.subr.bf16.mxu1 %v2583_v45 }
  0x52   : > { %2231 = vmatpush3.bf16.msra.mxu0 %v2590_v55 }
  0x53   : > { %656 = vperm.xlu0 %2504, %v2856_v9   ;;  %368 = vperm.xlu1 %2502, %v2856_v9  }
  0x54   : > { %2347 = vmatpush3.bf16.msra.mxu1 %v2584_v47  ;;  %2232 = vmatprep.subr.bf16.mxu0 %v2591_v56 }
  0x56   : > { %2233 = vmatpush3.bf16.msra.mxu0 %v2592_v57 }
  0x57   : > { %2523 = vset.pattern.permute.xlu0 %v2696_v12  ;;  %378 = vperm.xlu1 %2502, %v2859_v10  }
  0x58   : > { %879 = vperm.xlu0 %2523, %v2864_v11   ;;  %2234 = vmatprep.subr.bf16.mxu0 %v2593_v58 }
  0x5a   : > { %2235 = vmatpush3.bf16.msra.mxu0 %v2594_v59 }
  0x5b   : > { %388 = vperm.xlu1 %2502, %v2869_v13  }
  0x5c   : > { %889 = vperm.xlu0 %2523, %v2826_v3  }
  0x5f   : > { %398 = vperm.xlu1 %2502, %v2875_v14  }
  0x60   : > { %899 = vperm.xlu0 %2523, %v2878_v16  }
  0x63   : > { %408 = vperm.xlu1 %2502, %v2883_v18  }
  0x64   : > { %909 = vperm.xlu0 %2523, %v2886_v20  }
  0x67   : > { %418 = vperm.xlu1 %2502, %v260_v22   ;;  %v3019_v22 = vld [vmem:[%s2820_s30 + $0xc8] sm:$0xff] }
  0x68   : > { %919 = vperm.xlu0 %2523, %v2892_v24  }
  0x6b   : > { %2503 = vset.pattern.permute.xlu1 %v2694_v0 }
  0x6c   : > { %929 = vperm.xlu0 %2523, %v2896_v28   ;;  %591 = vperm.xlu1 %2503, %v2864_v11  }
  0x70   : > { %939 = vperm.xlu0 %2523, %v2902_v31   ;;  %2505 = vset.pattern.permute.xlu1 %v2697_v33 }
  0x71   : > { %1167 = vperm.xlu1 %2505, %v2864_v11  }
  0x74   : > { %949 = vperm.xlu0 %2523, %v2908_v36  }
  0x75   : > { %1172 = vperm.xlu1 %2505, %v2823_v2  }
  0x78   : > { %959 = vperm.xlu0 %2523, %v2913_v41  }
  0x79   : > { %2506 = vset.pattern.permute.xlu1 %v2696_v12 }
  0x7a   : > { %884 = vperm.xlu1 %2506, %v2823_v2  }
  0x7c   : > { %969 = vperm.xlu0 %2523, %v2918_v46  }
  0x7e   : > { %2507 = vset.pattern.permute.xlu1 %v2694_v0 }
  0x7f   : > { %601 = vperm.xlu1 %2507, %v2826_v3  }
  0x80   : > { %979 = vperm.xlu0 %2523, %v2923_v50  }
  0x83   : > { %2508 = vset.pattern.permute.xlu1 %v2697_v33 }
  0x84   : > { %989 = vperm.xlu0 %2523, %v2929_v53   ;;  %1177 = vperm.xlu1 %2508, %v2826_v3  }
  0x88   : > { %2540 = vset.pattern.permute.xlu0 %v3404_v1  ;;  %1182 = vperm.xlu1 %2508, %v2831_v4  }
  0x89   : > { %303 = vperm.xlu0 %2540, %v2864_v11  }
  0x8c   : > { %2509 = vset.pattern.permute.xlu1 %v2696_v12 }
  0x8d   : > { %894 = vperm.xlu1 %2509, %v2831_v4   ;;  %308 = vperm.xlu0 %2540, %v2823_v2  }
  0x91   : > { %2510 = vset.pattern.permute.xlu1 %v2694_v0  ;;  %323 = vperm.xlu0 %2540, %v2878_v16  }
  0x92   : > { %611 = vperm.xlu1 %2510, %v2878_v16  }
  0x95   : > { %333 = vperm.xlu0 %2540, %v2886_v20  }
  0x96   : > { %2511 = vset.pattern.permute.xlu1 %v2697_v33 }
  0x97   : > { %1187 = vperm.xlu1 %2511, %v2878_v16  }
  0x99   : > { %343 = vperm.xlu0 %2540, %v2892_v24  }
  0x9b   : > { %1192 = vperm.xlu1 %2511, %v2836_v5  }
  0x9d   : > { %353 = vperm.xlu0 %2540, %v2896_v28  }
  0x9f   : > { %2512 = vset.pattern.permute.xlu1 %v2696_v12 }
  0xa0   : > { %904 = vperm.xlu1 %2512, %v2836_v5  }
  0xa1   : > { %363 = vperm.xlu0 %2540, %v2902_v31  }
  0xa4   : > { %2513 = vset.pattern.permute.xlu1 %v2694_v0 }
  0xa5   : > { %621 = vperm.xlu1 %2513, %v2886_v20   ;;  %373 = vperm.xlu0 %2540, %v2908_v36  }
  0xa9   : > { %2514 = vset.pattern.permute.xlu1 %v2697_v33  ;;  %383 = vperm.xlu0 %2540, %v2913_v41  }
  0xaa   : > { %1197 = vperm.xlu1 %2514, %v2886_v20  }
  0xad   : > { %393 = vperm.xlu0 %2540, %v2918_v46  }
  0xae   : > { %1202 = vperm.xlu1 %2514, %v2841_v6  }
  0xb1   : > { %403 = vperm.xlu0 %2540, %v2923_v50  }
  0xb2   : > { %2515 = vset.pattern.permute.xlu1 %v2696_v12 }
  0xb3   : > { %914 = vperm.xlu1 %2515, %v2841_v6  }
  0xb5   : > { %413 = vperm.xlu0 %2540, %v2929_v53  }
  0xb7   : > { %2516 = vset.pattern.permute.xlu1 %v2694_v0 }
  0xb8   : > { %631 = vperm.xlu1 %2516, %v2892_v24  }
  0xb9   : > { %423 = vperm.xlu0 %2540, %v2965_v60  }
  0xba   : > { %v2970_v61 = vpop.permute.xlu1 %313  ;;  %v597_v62 = vpop.permute.xlu0 %596 }
  0xbb   : > { %v750_v37 = vmul.f32 %v597_v62, %v3063_v34 }
  0xbc   : > { %2517 = vset.pattern.permute.xlu1 %v2697_v33 }
  0xbd   : > { %1207 = vperm.xlu1 %2517, %v2892_v24   ;;  %438 = vperm.xlu0 %2540, %v2973_v63   ;;  %v3026_v24 = vld [vmem:[%s2820_s30 + $0xd0] sm:$0xff] }
  0xbe   : > { %v2978_v2 = vpop.permute.xlu1 %318  ;;  %v2980_v3 = vpop.permute.xlu0 %606 }
  0xc1   : > { %1212 = vperm.xlu1 %2517, %v2844_v7   ;;  %2548 = vset.pattern.permute.xlu0 %v2694_v0 }
  0xc2   : > { %v2984_v4 = vpop.permute.xlu1 %328  ;;  %v2986_v5 = vpop.permute.xlu0 %616  ;;  %666 = vperm.xlu0 %2548, %v2859_v10  }
  0xc5   : > { %2518 = vset.pattern.permute.xlu1 %v2696_v12 }
  0xc6   : > { %924 = vperm.xlu1 %2518, %v2844_v7   ;;  %v2991_v6 = vpop.permute.xlu1 %338  ;;  %v2993_v11 = vpop.permute.xlu0 %626  ;;  %676 = vperm.xlu0 %2548, %v2869_v13  }
  0xca   : > { %2519 = vset.pattern.permute.xlu1 %v2694_v0  ;;  %v2997_v15 = vpop.permute.xlu1 %348  ;;  %v2999_v16 = vpop.permute.xlu0 %636  ;;  %686 = vperm.xlu0 %2548, %v2875_v14  }
  0xcb   : > { %641 = vperm.xlu1 %2519, %v2896_v28  }
  0xce   : > { %v3003_v17 = vpop.permute.xlu1 %358  ;;  %v3005_v7 = vpop.permute.xlu0 %646  ;;  %696 = vperm.xlu0 %2548, %v2883_v18  }
  0xcf   : > { %2520 = vset.pattern.permute.xlu1 %v2697_v33 }
  0xd0   : > { %1217 = vperm.xlu1 %2520, %v2896_v28  }
  0xd2   : > { %v3013_v20 = vpop.permute.xlu1 %368  ;;  %v3015_v21 = vpop.permute.xlu0 %656  ;;  %706 = vperm.xlu0 %2548, %v3010_v19  }
  0xd4   : > { %1222 = vperm.xlu1 %2520, %v2851_v8  }
  0xd6   : > { %v3022_v23 = vpop.permute.xlu1 %378  ;;  %716 = vperm.xlu0 %2548, %v3019_v22  }
  0xd7   : > { %v880_v18 = vpop.permute.xlu0 %879 }
  0xd8   : > { %2521 = vset.pattern.permute.xlu1 %v2696_v12 }
  0xd9   : > { %934 = vperm.xlu1 %2521, %v2851_v8  }
  0xda   : > { %v3030_v25 = vpop.permute.xlu1 %388  ;;  %721 = vperm.xlu0 %2548, %v3026_v24  }
  0xdb   : > { %v3033_v26 = vpop.permute.xlu0 %889 }
  0xdd   : > { %2522 = vset.pattern.permute.xlu1 %v2694_v0 }
  0xde   : > { %651 = vperm.xlu1 %2522, %v2902_v31   ;;  %v3040_v28 = vpop.permute.xlu1 %398  ;;  %736 = vperm.xlu0 %2548, %v3036_v27  }
  0xdf   : > { %v3043_v29 = vpop.permute.xlu0 %899 }
  0xe2   : > { %2524 = vset.pattern.permute.xlu1 %v2697_v33  ;;  %v3046_v8 = vpop.permute.xlu1 %408  ;;  %2552 = vset.pattern.permute.xlu0 %v2697_v33 }
  0xe3   : > { %1227 = vperm.xlu1 %2524, %v2902_v31   ;;  %v3050_v30 = vpop.permute.xlu0 %909  ;;  %1292 = vperm.xlu0 %2552, %v3019_v22   ;;  %v845_v31 = vld [vmem:[%s3058_s7] sm:$0xff] }
  0xe4   : > { %v1037_v54 = vmul.f32 %v880_v18, %v845_v31 }
  0xe6   : > { %v3060_v32 = vpop.permute.xlu1 %418 }
  0xe7   : > { %1232 = vperm.xlu1 %2524, %v2856_v9   ;;  %v3066_v35 = vpop.permute.xlu0 %919 }
  0xeb   : > { %2525 = vset.pattern.permute.xlu1 %v2696_v12  ;;  %v592_v38 = vpop.permute.xlu1 %591  ;;  %v3071_v39 = vpop.permute.xlu0 %929 }
  0xec   : > { %v749_v40 = vmul.f32 %v845_v31, %v592_v38  ;;  %944 = vperm.xlu1 %2525, %v2856_v9   ;;  %v3084_v9 = vld [vmem:[%s2820_s30 + $0xe0] sm:$0xff]  ;;  %v272_v38 = vld [vmem:[%s3058_s7 + $0x18] sm:$0xff] }
  0xed   : > { %1307 = vperm.xlu0 %2552, %v3084_v9  }
  0xee   : > { %v781_v42 = vpack.c.bf16 %v750_v37, %v749_v40  ;;  %v271_v37 = vld [vmem:[%s3058_s7 + $0x10] sm:$0xff] }
  0xef   : > { %v3074_v43 = vpop.permute.xlu0 %939 }
  0xf0   : > { %2526 = vset.pattern.permute.xlu1 %v2694_v0  ;;  %1748 = vmatprep.mubr.bf16.mxu0 %v781_v42  ;;  %v1168_v44 = vpop.permute.xlu1 %1167 }
  0xf1   : > { %661 = vperm.xlu1 %2526, %v2908_v36   ;;  %v1325_v48 = vmul.f32 %v1168_v44, %v845_v31  ;;  %2554 = vset.pattern.permute.xlu0 %v2696_v12 }
  0xf2   : > { %1009 = vperm.xlu0 %2554, %v3026_v24  }
  0xf3   : > { %v3078_v45 = vpop.permute.xlu0 %949 }
  0xf4   : > { %v1173_v47 = vpop.permute.xlu1 %1172 }
  0xf5   : > { %v1326_v49 = vmul.f32 %v1173_v47, %v3063_v34  ;;  %2527 = vset.pattern.permute.xlu1 %v2697_v33 }
  0xf6   : > { %1237 = vperm.xlu1 %2527, %v2908_v36   ;;  %1024 = vperm.xlu0 %2554, %v3036_v27  }
  0xf7   : > { %v3086_v51 = vpop.permute.xlu0 %959  ;;  %v1357_v52 = vpack.c.bf16 %v1326_v49, %v1325_v48  ;;  %v1039_v48 = vmul.f32 %v3033_v26, %v271_v37 }
  0xf9   : > { %1909 = vmatprep.mubr.bf16.mxu1 %v1357_v52  ;;  %v885_v55 = vpop.permute.xlu1 %884 }
  0xfa   : > { %v1038_v56 = vmul.f32 %v885_v55, %v3063_v34  ;;  %1242 = vperm.xlu1 %2527, %v2859_v10   ;;  %2558 = vset.pattern.permute.xlu0 %v3404_v1  ;;  %v752_v55 = vmul.f32 %v2980_v3, %v272_v38  ;;  %v464_v3 = vmul.f32 %v2978_v2, %v272_v38 }
  0xfb   : > { %v3091_v57 = vpop.permute.xlu0 %969 }
  0xfc   : > { %v1069_v36 = vpack.c.bf16 %v1038_v56, %v1037_v54 }
  0xfe   : > { %2528 = vset.pattern.permute.xlu1 %v2696_v12  ;;  %1910 = vmatmul.mubr.bf16.vlgmr.msra.gmra.mrb[0].mxu1 %v1069_v36  ;;  %v602_v58 = vpop.permute.xlu1 %601 }
  0xff   : > { %954 = vperm.xlu1 %2528, %v2859_v10   ;;  %v3097_v59 = vpop.permute.xlu0 %979  ;;  %v751_v56 = vmul.f32 %v602_v58, %v271_v37  ;;  %v274_v58 = vld [vmem:[%s3058_s7 + $0x28] sm:$0xff] }
 0x103   : > { %2529 = vset.pattern.permute.xlu1 %v2694_v0  ;;  %v1178_v62 = vpop.permute.xlu1 %1177  ;;  %v3101_v18 = vpop.permute.xlu0 %989 }
 0x104   : > { %671 = vperm.xlu1 %2529, %v2913_v41   ;;  %v1327_v42 = vmul.f32 %v1178_v62, %v271_v37 }
 0x107   : > { %v1183_v40 = vpop.permute.xlu1 %1182 }
 0x108   : > { %v1328_v44 = vmul.f32 %v1183_v40, %v272_v38  ;;  %2530 = vset.pattern.permute.xlu1 %v2697_v33  ;;  %v304_v10 = vpop.permute.xlu0 %303 }
 0x109   : > { %1247 = vperm.xlu1 %2530, %v2913_v41   ;;  %v461_v49 = vmul.f32 %v845_v31, %v304_v10  ;;  %v782_v41 = vpack.c.bf16 %v752_v55, %v751_v56  ;;  %v849_v31 = vld [vmem:[%s3058_s7 + $0x20] sm:$0xff] }
 0x10a   : > { %v1358_v47 = vpack.c.bf16 %v1328_v44, %v1327_v42  ;;  %v463_v44 = vmul.f32 %v2970_v61, %v271_v37 }
 0x10c   : > { %1917 = vmatprep.mubr.bf16.mxu1 %v1358_v47  ;;  %v895_v52 = vpop.permute.xlu1 %894  ;;  %v309_v54 = vpop.permute.xlu0 %308  ;;  %v494_v47 = vpack.c.bf16 %v464_v3, %v463_v44 }
 0x10d   : > { %v1040_v36 = vmul.f32 %v895_v52, %v272_v38  ;;  %v462_v62 = vmul.f32 %v3063_v34, %v309_v54  ;;  %1252 = vperm.xlu1 %2530, %v2869_v13   ;;  %v754_v34 = vmul.f32 %v2986_v5, %v274_v58  ;;  %v466_v52 = vmul.f32 %v2984_v4, %v274_v58 }
 0x10e   : > { %v1041_v54 = vmul.f32 %v3043_v29, %v849_v31 }
 0x10f   : > { %v1070_v40 = vpack.c.bf16 %v1040_v36, %v1039_v48  ;;  %v493_v1 = vpack.c.bf16 %v462_v62, %v461_v49  ;;  %v3123_v48 = vld [vmem:[%s2820_s30 + $0xf0] sm:$0xff]  ;;  %v3129_v49 = vld [vmem:[%s2820_s30 + $0xf8] sm:$0xff] }
 0x110   : > { %453 = vperm.xlu0 %2558, %v3123_v48   ;;  %v851_v62 = vld [vmem:[%s3058_s7 + $0x30] sm:$0xff] }
 0x111   : > { %2531 = vset.pattern.permute.xlu1 %v2696_v12  ;;  %1918 = vmatmul.mubr.bf16.gmra.mrb[4].mxu1 %v1070_v40  ;;  %v612_v26 = vpop.permute.xlu1 %611 }
 0x112   : > { %1749 = vmatmul.mubr.bf16.vlgmr.msra.gmra.mrb[0].mxu0 %v493_v1  ;;  %964 = vperm.xlu1 %2531, %v2869_v13   ;;  %v753_v42 = vmul.f32 %v849_v31, %v612_v26  ;;  %v324_v1 = vpop.permute.xlu0 %323 }
 0x113   : > { %1756 = vmatprep.mubr.bf16.mxu0 %v782_v41  ;;  %v465_v61 = vmul.f32 %v849_v31, %v324_v1 }
 0x114   : > { %v783_v13 = vpack.c.bf16 %v754_v34, %v753_v42  ;;  %2561 = vset.pattern.permute.xlu0 %v2697_v33 }
 0x115   : > { %1322 = vperm.xlu0 %2561, %v3129_v49   ;;  %v495_v56 = vpack.c.bf16 %v466_v52, %v465_v61 }
 0x116   : > { %2532 = vset.pattern.permute.xlu1 %v2694_v0  ;;  %v1188_v10 = vpop.permute.xlu1 %1187  ;;  %v334_v40 = vpop.permute.xlu0 %333 }
 0x117   : > { %681 = vperm.xlu1 %2532, %v2918_v46   ;;  %v1329_v38 = vmul.f32 %v1188_v10, %v849_v31  ;;  %v467_v3 = vmul.f32 %v851_v62, %v334_v40 }
 0x11a   : > { %1757 = vmatmul.mubr.bf16.gmra.mrb[4].mxu0 %v494_v47  ;;  %v1193_v2 = vpop.permute.xlu1 %1192  ;;  %v1043_v47 = vmul.f32 %v3050_v30, %v851_v62  ;;  %v344_v1 = vpop.permute.xlu0 %343 }
 0x11b   : > { %v1330_v5 = vmul.f32 %v1193_v2, %v274_v58  ;;  %1764 = vmatprep.mubr.bf16.mxu0 %v783_v13  ;;  %2533 = vset.pattern.permute.xlu1 %v2697_v33 }
 0x11c   : > { %1257 = vperm.xlu1 %2533, %v2918_v46   ;;  %v276_v46 = vld [vmem:[%s3058_s7 + $0x38] sm:$0xff] }
 0x11d   : > { %v1359_v37 = vpack.c.bf16 %v1330_v5, %v1329_v38  ;;  %v756_v26 = vmul.f32 %v2993_v11, %v276_v46  ;;  %v468_v31 = vmul.f32 %v2991_v6, %v276_v46  ;;  %v1122_v6 = vld [vmem:[%s2820_s30 + $0xa8] sm:$0xff]  ;;  %v853_v38 = vld [vmem:[%s3058_s7 + $0x40] sm:$0xff]  ;;  %s2629_s30 = scalar_lea.vmem %s2628_s29, 8192 }
 0x11e   : > { %v278_v5 = vld [vmem:[%s3058_s7 + $0x48] sm:$0xff]  ;;  %v469_v52 = vmul.f32 %v853_v38, %v344_v1  ;;  %p2631_p3 = scmp.lt.s32.totalorder %s2629_s30, %s2623_s27 }
 0x11f   : > { %1925 = vmatprep.mubr.bf16.mxu1 %v1359_v37  ;;  %v905_v55 = vpop.permute.xlu1 %904  ;;  %v496_v34 = vpack.c.bf16 %v468_v31, %v467_v3  ;;  %v758_v37 = vmul.f32 %v2999_v16, %v278_v5  ;;  %v470_v30 = vmul.f32 %v2997_v15, %v278_v5  ;;  %v855_v31 = vld [vmem:[%s3058_s7 + $0x50] sm:$0xff] }
 0x120   : > { %v1042_v36 = vmul.f32 %v905_v55, %v274_v58  ;;  %1262 = vperm.xlu1 %2533, %v2875_v14   ;;  %p2632_p4 = por %p2631_p3, %p2630_p2 }
 0x122   : > { %v1071_v41 = vpack.c.bf16 %v1042_v36, %v1041_v54  ;;  %1765 = vmatmul.mubr.bf16.gmra.mrb[8].mxu0 %v495_v56  ;;  %v497_v36 = vpack.c.bf16 %v470_v30, %v469_v52  ;;  %v857_v52 = vld [vmem:[%s3058_s7 + $0x60] sm:$0xff]  ;;  %p2633_p7 = pnand %p2632_p4, %p2626_p12 }
 0x124   : > { %2534 = vset.pattern.permute.xlu1 %v2696_v12  ;;  %1926 = vmatmul.mubr.bf16.gmra.mrb[8].mxu1 %v1071_v41  ;;  %v622_v4 = vpop.permute.xlu1 %621 }
 0x125   : > { %v755_v29 = vmul.f32 %v851_v62, %v622_v4  ;;  %974 = vperm.xlu1 %2534, %v2875_v14  }
 0x127   : > { %v784_v58 = vpack.c.bf16 %v756_v26, %v755_v29  ;;  %v1045_v26 = vmul.f32 %v3066_v35, %v853_v38 }
 0x129   : > { %2535 = vset.pattern.permute.xlu1 %v2694_v0  ;;  %v1198_v42 = vpop.permute.xlu1 %1197  ;;  %1772 = vmatprep.mubr.bf16.mxu0 %v784_v58  ;;  %v280_v58 = vld [vmem:[%s3058_s7 + $0x58] sm:$0xff] }
 0x12a   : > { %691 = vperm.xlu1 %2535, %v2923_v50   ;;  %1773 = vmatmul.mubr.bf16.gmra.mrb[12].mxu0 %v496_v34  ;;  %v1331_v44 = vmul.f32 %v1198_v42, %v851_v62  ;;  %v760_v42 = vmul.f32 %v3005_v7, %v280_v58 }
 0x12d   : > { %v1203_v11 = vpop.permute.xlu1 %1202 }
 0x12e   : > { %v1332_v10 = vmul.f32 %v1203_v11, %v276_v46  ;;  %2536 = vset.pattern.permute.xlu1 %v2697_v33 }
 0x12f   : > { %1267 = vperm.xlu1 %2536, %v2923_v50   ;;  %v354_v50 = vpop.permute.xlu0 %353 }
 0x130   : > { %v1360_v14 = vpack.c.bf16 %v1332_v10, %v1331_v44  ;;  %v471_v11 = vmul.f32 %v855_v31, %v354_v50  ;;  %v472_v10 = vmul.f32 %v3003_v17, %v280_v58 }
 0x132   : > { %1933 = vmatprep.mubr.bf16.mxu1 %v1360_v14  ;;  %v915_v13 = vpop.permute.xlu1 %914 }
 0x133   : > { %v1044_v2 = vmul.f32 %v915_v13, %v276_v46  ;;  %1272 = vperm.xlu1 %2536, %v1122_v6   ;;  %v364_v16 = vpop.permute.xlu0 %363 }
 0x135   : > { %v1072_v61 = vpack.c.bf16 %v1044_v2, %v1043_v47 }
 0x137   : > { %2537 = vset.pattern.permute.xlu1 %v2696_v12  ;;  %1934 = vmatmul.mubr.bf16.gmra.mrb[12].mxu1 %v1072_v61  ;;  %v632_v54 = vpop.permute.xlu1 %631  ;;  %v3158_v3 = vpop.permute.xlu0 %373 }
 0x138   : > { %v757_v55 = vmul.f32 %v853_v38, %v632_v54  ;;  %984 = vperm.xlu1 %2537, %v1122_v6   ;;  %v498_v6 = vpack.c.bf16 %v472_v10, %v471_v11  ;;  %v282_v54 = vld [vmem:[%s3058_s7 + $0x68] sm:$0xff] }
 0x13a   : > { %v785_v56 = vpack.c.bf16 %v758_v37, %v757_v55  ;;  %v762_v55 = vmul.f32 %v3015_v21, %v282_v54 }
 0x13b   : > { %v3164_v44 = vpop.permute.xlu0 %383 }
 0x13c   : > { %2538 = vset.pattern.permute.xlu1 %v2694_v0  ;;  %v1208_v62 = vpop.permute.xlu1 %1207  ;;  %1780 = vmatprep.mubr.bf16.mxu0 %v785_v56  ;;  %v473_v56 = vmul.f32 %v857_v52, %v364_v16 }
 0x13d   : > { %701 = vperm.xlu1 %2538, %v2929_v53   ;;  %1781 = vmatmul.mubr.bf16.gmra.mrb[16].mxu0 %v497_v36  ;;  %v1333_v46 = vmul.f32 %v1208_v62, %v853_v38  ;;  %v3413_v38 = vmov 0  }
 0x13f   : > { %v3170_v7 = vpop.permute.xlu0 %393 }
 0x140   : > { %v1213_v40 = vpop.permute.xlu1 %1212 }
 0x141   : > { %v1334_v41 = vmul.f32 %v1213_v40, %v278_v5  ;;  %2539 = vset.pattern.permute.xlu1 %v2697_v33 }
 0x142   : > { %1277 = vperm.xlu1 %2539, %v2929_v53  }
 0x143   : > { %v1361_v15 = vpack.c.bf16 %v1334_v41, %v1333_v46  ;;  %v3175_v17 = vpop.permute.xlu0 %403 }
 0x145   : > { %1941 = vmatprep.mubr.bf16.mxu1 %v1361_v15  ;;  %v925_v4 = vpop.permute.xlu1 %924 }
 0x146   : > { %v1046_v29 = vmul.f32 %v925_v4, %v278_v5  ;;  %1282 = vperm.xlu1 %2539, %v3010_v19   ;;  %v1047_v5 = vmul.f32 %v3071_v39, %v855_v31  ;;  %v474_v39 = vmul.f32 %v3013_v20, %v282_v54  ;;  %v1049_v20 = vmul.f32 %v3074_v43, %v857_v52 }
 0x147   : > { %v3183_v30 = vpop.permute.xlu0 %413 }
 0x148   : > { %v1073_v34 = vpack.c.bf16 %v1046_v29, %v1045_v26  ;;  %v499_v41 = vpack.c.bf16 %v474_v39, %v473_v56  ;;  %v1150_v39 = vld [vmem:[%s3058_s7 + $0x88] sm:$0xff] }
 0x14a   : > { %2541 = vset.pattern.permute.xlu1 %v2696_v12  ;;  %1942 = vmatmul.mubr.bf16.gmra.mrb[16].mxu1 %v1073_v34  ;;  %v642_v53 = vpop.permute.xlu1 %641  ;;  %v284_v34 = vld [vmem:[%s3058_s7 + $0x78] sm:$0xff] }
 0x14b   : > { %v759_v35 = vmul.f32 %v855_v31, %v642_v53  ;;  %994 = vperm.xlu1 %2541, %v3010_v19   ;;  %v3188_v46 = vpop.permute.xlu0 %423  ;;  %v476_v43 = vmul.f32 %v3022_v23, %v284_v34 }
 0x14d   : > { %v786_v14 = vpack.c.bf16 %v760_v42, %v759_v35 }
 0x14f   : > { %2542 = vset.pattern.permute.xlu1 %v2694_v0  ;;  %v1218_v47 = vpop.permute.xlu1 %1217  ;;  %1788 = vmatprep.mubr.bf16.mxu0 %v786_v14  ;;  %v3191_v16 = vpop.permute.xlu0 %438 }
 0x150   : > { %711 = vperm.xlu1 %2542, %v2965_v60   ;;  %1789 = vmatmul.mubr.bf16.gmra.mrb[20].mxu0 %v498_v6  ;;  %v1335_v13 = vmul.f32 %v1218_v47, %v855_v31 }
 0x153   : > { %v1223_v1 = vpop.permute.xlu1 %1222 }
 0x154   : > { %v1336_v2 = vmul.f32 %v1223_v1, %v280_v58  ;;  %2543 = vset.pattern.permute.xlu1 %v3413_v38 }
 0x155   : > { %428 = vperm.xlu1 %2543, %v3019_v22  }
 0x156   : > { %v1362_v19 = vpack.c.bf16 %v1336_v2, %v1335_v13 }
 0x158   : > { %1949 = vmatprep.mubr.bf16.mxu1 %v1362_v19  ;;  %v935_v61 = vpop.permute.xlu1 %934 }
 0x159   : > { %v1048_v37 = vmul.f32 %v935_v61, %v280_v58  ;;  %2544 = vset.pattern.permute.xlu1 %v2697_v33  ;;  %v859_v58 = vld [vmem:[%s3058_s7 + $0x70] sm:$0xff]  ;;  %v861_v61 = vld [vmem:[%s3058_s7 + $0x80] sm:$0xff] }
 0x15a   : > { %1287 = vperm.xlu1 %2544, %v2965_v60   ;;  %v475_v53 = vmul.f32 %v859_v58, %v3158_v3  ;;  %v1051_v23 = vmul.f32 %v3078_v45, %v859_v58 }
 0x15b   : > { %v1074_v50 = vpack.c.bf16 %v1048_v37, %v1047_v5  ;;  %v286_v37 = vld [vmem:[%s3058_s7 + $0x88] sm:$0xff] }
 0x15c   : > { %v500_v6 = vpack.c.bf16 %v476_v43, %v475_v53  ;;  %v478_v45 = vmul.f32 %v3030_v25, %v286_v37 }
 0x15d   : > { %1950 = vmatmul.mubr.bf16.gmra.mrb[20].mxu1 %v1074_v50  ;;  %v652_v36 = vpop.permute.xlu1 %651  ;;  %v477_v50 = vmul.f32 %v861_v61, %v3164_v44 }
 0x15e   : > { %v761_v62 = vmul.f32 %v857_v52, %v652_v36  ;;  %2545 = vset.pattern.permute.xlu1 %v2696_v12 }
 0x15f   : > { %999 = vperm.xlu1 %2545, %v2965_v60   ;;  %v501_v36 = vpack.c.bf16 %v478_v45, %v477_v50  ;;  %v867_v50 = vld [vmem:[%s3058_s7 + $0xb0] sm:$0xff] }
 0x160   : > { %v787_v40 = vpack.c.bf16 %v762_v55, %v761_v62 }
 0x162   : > { %v1228_v15 = vpop.permute.xlu1 %1227  ;;  %1796 = vmatprep.mubr.bf16.mxu0 %v787_v40 }
 0x163   : > { %1004 = vperm.xlu1 %2545, %v3019_v22   ;;  %1797 = vmatmul.mubr.bf16.gmra.mrb[24].mxu0 %v499_v41  ;;  %v1337_v26 = vmul.f32 %v1228_v15, %v857_v52  ;;  %v667_v22 = vpop.permute.xlu0 %666 }
 0x164   : > { %v764_v11 = vmul.f32 %v667_v22, %v284_v34 }
 0x166   : > { %v1233_v21 = vpop.permute.xlu1 %1232 }
 0x167   : > { %v1338_v4 = vmul.f32 %v1233_v21, %v282_v54  ;;  %2546 = vset.pattern.permute.xlu1 %v2694_v0  ;;  %v677_v5 = vpop.permute.xlu0 %676  ;;  %v1053_v21 = vmul.f32 %v3086_v51, %v861_v61 }
 0x168   : > { %726 = vperm.xlu1 %2546, %v2973_v63  }
 0x169   : > { %v1363_v60 = vpack.c.bf16 %v1338_v4, %v1337_v26  ;;  %v576_v4 = vld [vmem:[%s3058_s7 + $0x98] sm:$0xff] }
 0x16b   : > { %1957 = vmatprep.mubr.bf16.mxu1 %v1363_v60  ;;  %v945_v29 = vpop.permute.xlu1 %944  ;;  %v687_v60 = vpop.permute.xlu0 %686 }
 0x16c   : > { %v1050_v31 = vmul.f32 %v945_v29, %v282_v54  ;;  %2547 = vset.pattern.permute.xlu1 %v3413_v38  ;;  %v766_v54 = vmul.f32 %v677_v5, %v286_v37  ;;  %v768_v22 = vmul.f32 %v687_v60, %v576_v4 }
 0x16d   : > { %433 = vperm.xlu1 %2547, %v3026_v24  }
 0x16e   : > { %v1075_v42 = vpack.c.bf16 %v1050_v31, %v1049_v20  ;;  %v863_v20 = vld [vmem:[%s3058_s7 + $0x90] sm:$0xff]  ;;  %v288_v31 = vld [vmem:[%s3058_s7 + $0x98] sm:$0xff] }
 0x16f   : > { %v480_v51 = vmul.f32 %v3040_v28, %v288_v31  ;;  %v293_v31 = vld [vmem:[%s3058_s7 + $0xc0] sm:$0xff] }
 0x170   : > { %1958 = vmatmul.mubr.bf16.gmra.mrb[24].mxu1 %v1075_v42  ;;  %v662_v35 = vpop.permute.xlu1 %661 }
 0x171   : > { %v763_v10 = vmul.f32 %v859_v58, %v662_v35  ;;  %2549 = vset.pattern.permute.xlu1 %v2697_v33 }
 0x172   : > { %1297 = vperm.xlu1 %2549, %v3026_v24  }
 0x173   : > { %v788_v14 = vpack.c.bf16 %v764_v11, %v763_v10  ;;  %v1055_v10 = vmul.f32 %v3091_v57, %v863_v20 }
 0x175   : > { %v1238_v47 = vpop.permute.xlu1 %1237  ;;  %1804 = vmatprep.mubr.bf16.mxu0 %v788_v14  ;;  %v578_v14 = vld [vmem:[%s3058_s7 + $0xa8] sm:$0xff] }
 0x176   : > { %1302 = vperm.xlu1 %2549, %v2973_v63   ;;  %1805 = vmatmul.mubr.bf16.gmra.mrb[28].mxu0 %v500_v6  ;;  %v1339_v3 = vmul.f32 %v1238_v47, %v859_v58  ;;  %v479_v58 = vmul.f32 %v863_v20, %v3170_v7  ;;  %v697_v6 = vpop.permute.xlu0 %696  ;;  %v865_v47 = vld [vmem:[%s3058_s7 + $0xa0] sm:$0xff] }
 0x178   : > { %v502_v11 = vpack.c.bf16 %v480_v51, %v479_v58 }
 0x179   : > { %v1243_v1 = vpop.permute.xlu1 %1242 }
 0x17a   : > { %v1340_v13 = vmul.f32 %v1243_v1, %v284_v34  ;;  %2550 = vset.pattern.permute.xlu1 %v2696_v12 }
 0x17b   : > { %1014 = vperm.xlu1 %2550, %v2973_v63  }
 0x17c   : > { %v1364_v2 = vpack.c.bf16 %v1340_v13, %v1339_v3  ;;  %v290_v3 = vld [vmem:[%s3058_s7 + $0xa8] sm:$0xff]  ;;  %v770_v13 = vmul.f32 %v697_v6, %v578_v14 }
 0x17d   : > { %v482_v57 = vmul.f32 %v3046_v8, %v290_v3  ;;  %v1057_v8 = vmul.f32 %v3097_v59, %v865_v47 }
 0x17e   : > { %1965 = vmatprep.mubr.bf16.mxu1 %v1364_v2  ;;  %v955_v24 = vpop.permute.xlu1 %954 }
 0x17f   : > { %v1052_v19 = vmul.f32 %v955_v24, %v284_v34  ;;  %2551 = vset.pattern.permute.xlu1 %v2694_v0 }
 0x180   : > { %731 = vperm.xlu1 %2551, %v3084_v9  }
 0x181   : > { %v1076_v52 = vpack.c.bf16 %v1052_v19, %v1051_v23 }
 0x183   : > { %1966 = vmatmul.mubr.bf16.gmra.mrb[28].mxu1 %v1076_v52  ;;  %v672_v63 = vpop.permute.xlu1 %671 }
 0x184   : > { %v765_v55 = vmul.f32 %v861_v61, %v672_v63  ;;  %2553 = vset.pattern.permute.xlu1 %v3413_v38 }
 0x185   : > { %443 = vperm.xlu1 %2553, %v3084_v9  }
 0x186   : > { %v789_v56 = vpack.c.bf16 %v766_v54, %v765_v55  ;;  %v580_v54 = vld [vmem:[%s3058_s7 + $0xb8] sm:$0xff] }
 0x187   : > { %v292_v55 = vld [vmem:[%s3058_s7 + $0xb8] sm:$0xff] }
 0x188   : > { %v1248_v62 = vpop.permute.xlu1 %1247  ;;  %1812 = vmatprep.mubr.bf16.mxu0 %v789_v56  ;;  %v483_v56 = vmul.f32 %v867_v50, %v3183_v30 }
 0x189   : > { %448 = vperm.xlu1 %2553, %v3036_v27   ;;  %1813 = vmatmul.mubr.bf16.gmra.mrb[32].mxu0 %v501_v36  ;;  %v1341_v40 = vmul.f32 %v1248_v62, %v861_v61  ;;  %v484_v62 = vmul.f32 %v3060_v32, %v292_v55 }
 0x18c   : > { %v1253_v44 = vpop.permute.xlu1 %1252 }
 0x18d   : > { %v1342_v41 = vmul.f32 %v1253_v44, %v1150_v39  ;;  %2555 = vset.pattern.permute.xlu1 %v2697_v33  ;;  %v504_v44 = vpack.c.bf16 %v484_v62, %v483_v56 }
 0x18e   : > { %1312 = vperm.xlu1 %2555, %v3036_v27  }
 0x18f   : > { %v1365_v25 = vpack.c.bf16 %v1342_v41, %v1341_v40 }
 0x191   : > { %1973 = vmatprep.mubr.bf16.mxu1 %v1365_v25  ;;  %v965_v15 = vpop.permute.xlu1 %964 }
 0x192   : > { %v1054_v26 = vmul.f32 %v1150_v39, %v965_v15  ;;  %2556 = vset.pattern.permute.xlu1 %v2696_v12 }
 0x193   : > { %1019 = vperm.xlu1 %2556, %v3084_v9  }
 0x194   : > { %v1077_v29 = vpack.c.bf16 %v1054_v26, %v1053_v21 }
 0x196   : > { %1974 = vmatmul.mubr.bf16.gmra.mrb[32].mxu1 %v1077_v29  ;;  %v682_v27 = vpop.permute.xlu1 %681 }
 0x197   : > { %v767_v34 = vmul.f32 %v863_v20, %v682_v27  ;;  %2557 = vset.pattern.permute.xlu1 %v2694_v0 }
 0x198   : > { %741 = vperm.xlu1 %2557, %v3123_v48  }
 0x199   : > { %v790_v42 = vpack.c.bf16 %v768_v22, %v767_v34 }
 0x19b   : > { %v1258_v53 = vpop.permute.xlu1 %1257  ;;  %1820 = vmatprep.mubr.bf16.mxu0 %v790_v42 }
 0x19c   : > { %746 = vperm.xlu1 %2557, %v3129_v49   ;;  %1821 = vmatmul.mubr.bf16.gmra.mrb[36].mxu0 %v502_v11  ;;  %v1343_v7 = vmul.f32 %v1258_v53, %v863_v20  ;;  %v582_v20 = vld [vmem:[%s3058_s7 + $0xc8] sm:$0xff] }
 0x19f   : > { %v1263_v9 = vpop.permute.xlu1 %1262 }
 0x1a0   : > { %v1344_v35 = vmul.f32 %v1263_v9, %v576_v4  ;;  %2559 = vset.pattern.permute.xlu1 %v3413_v38  ;;  %v481_v38 = vmul.f32 %v865_v47, %v3175_v17 }
 0x1a1   : > { %458 = vperm.xlu1 %2559, %v3129_v49  }
 0x1a2   : > { %v1366_v0 = vpack.c.bf16 %v1344_v35, %v1343_v7  ;;  %v503_v24 = vpack.c.bf16 %v482_v57, %v481_v38 }
 0x1a4   : > { %1981 = vmatprep.mubr.bf16.mxu1 %v1366_v0  ;;  %v975_v28 = vpop.permute.xlu1 %974 }
 0x1a5   : > { %v1056_v43 = vmul.f32 %v975_v28, %v576_v4  ;;  %2560 = vset.pattern.permute.xlu1 %v2697_v33  ;;  %v1059_v4 = vmul.f32 %v3101_v18, %v867_v50  ;;  %v485_v18 = vmul.f32 %v3188_v46, %v293_v31 }
 0x1a6   : > { %1317 = vperm.xlu1 %2560, %v3123_v48  }
 0x1a7   : > { %v1078_v1 = vpack.c.bf16 %v1056_v43, %v1055_v10 }
 0x1a9   : > { %1982 = vmatmul.mubr.bf16.gmra.mrb[36].mxu1 %v1078_v1  ;;  %v692_v2 = vpop.permute.xlu1 %691 }
 0x1aa   : > { %v769_v23 = vmul.f32 %v865_v47, %v692_v2  ;;  %2562 = vset.pattern.permute.xlu1 %v2696_v12  ;;  %v3257_v2 = vld [vmem:[%s3058_s7 + $0xd0] sm:$0xff] }
 0x1ab   : > { %1029 = vperm.xlu1 %2562, %v3123_v48   ;;  %v707_v48 = vpop.permute.xlu0 %706 }
 0x1ac   : > { %v791_v33 = vpack.c.bf16 %v770_v13, %v769_v23  ;;  %v772_v45 = vmul.f32 %v707_v48, %v580_v54 }
 0x1ae   : > { %v1268_v19 = vpop.permute.xlu1 %1267  ;;  %1828 = vmatprep.mubr.bf16.mxu0 %v791_v33 }
 0x1af   : > { %1034 = vperm.xlu1 %2562, %v3129_v49   ;;  %1829 = vmatmul.mubr.bf16.gmra.mrb[40].mxu0 %v503_v24  ;;  %v1345_v5 = vmul.f32 %v1268_v19, %v865_v47  ;;  %v717_v59 = vpop.permute.xlu0 %716  ;;  %v3263_v24 = vld [vmem:[%s3399_s3] ss:$0 sm:$0xff] }
 0x1b0   : > { %v774_v29 = vmul.f32 %v717_v59, %v582_v20 }
 0x1b2   : > { %v1273_v17 = vpop.permute.xlu1 %1272 }
 0x1b3   : > { %v1346_v61 = vmul.f32 %v1273_v17, %v578_v14  ;;  %v722_v26 = vpop.permute.xlu0 %721 }
 0x1b5   : > { %v1367_v37 = vpack.c.bf16 %v1346_v61, %v1345_v5  ;;  %v775_v61 = vmul.f32 %v722_v26, %v3257_v2 }
 0x1b7   : > { %1989 = vmatprep.mubr.bf16.mxu1 %v1367_v37  ;;  %v985_v12 = vpop.permute.xlu1 %984  ;;  %v3253_v58 = vpop.permute.xlu0 %736 }
 0x1b8   : > { %v1058_v52 = vmul.f32 %v985_v12, %v578_v14 }
 0x1ba   : > { %v1079_v63 = vpack.c.bf16 %v1058_v52, %v1057_v8  ;;  %v296_v52 = vld [vmem:[%s3058_s7 + $0xd8] sm:$0xff] }
 0x1bb   : > { %v1293_v28 = vpop.permute.xlu0 %1292 }
 0x1bc   : > { %1990 = vmatmul.mubr.bf16.gmra.mrb[40].mxu1 %v1079_v63  ;;  %v702_v49 = vpop.permute.xlu1 %701  ;;  %v1350_v43 = vmul.f32 %v1293_v28, %v582_v20 }
 0x1bd   : > { %v771_v36 = vmul.f32 %v867_v50, %v702_v49 }
 0x1bf   : > { %v792_v39 = vpack.c.bf16 %v772_v45, %v771_v36 }
 0x1c1   : > { %v1278_v40 = vpop.permute.xlu1 %1277  ;;  %1836 = vmatprep.mubr.bf16.mxu0 %v792_v39  ;;  %v488_v39 = vmul.f32 %v3191_v16, %v296_v52 }
 0x1c2   : > { %1837 = vmatmul.mubr.bf16.gmra.mrb[44].mxu0 %v504_v44  ;;  %v1347_v25 = vmul.f32 %v1278_v40, %v867_v50 }
 0x1c5   : > { %v1283_v41 = vpop.permute.xlu1 %1282 }
 0x1c6   : > { %v1348_v15 = vmul.f32 %v1283_v41, %v580_v54 }
 0x1c8   : > { %v1368_v21 = vpack.c.bf16 %v1348_v15, %v1347_v25 }
 0x1ca   : > { %1997 = vmatprep.mubr.bf16.mxu1 %v1368_v21  ;;  %v995_v30 = vpop.permute.xlu1 %994 }
 0x1cb   : > { %v1060_v60 = vmul.f32 %v995_v30, %v580_v54  ;;  %v1308_v30 = vpop.permute.xlu0 %1307 }
 0x1cd   : > { %v1080_v32 = vpack.c.bf16 %v1060_v60, %v1059_v4 }
 0x1cf   : > { %1998 = vmatmul.mubr.bf16.gmra.mrb[44].mxu1 %v1080_v32  ;;  %v712_v22 = vpop.permute.xlu1 %711 }
 0x1d0   : > { %v773_v27 = vmul.f32 %v712_v22, %v293_v31 }
 0x1d1   : > { %v2348_v34 = vpop.f32.mrb[0].mxu1 }
 0x1d2   : > { %v793_v51 = vpack.c.bf16 %v774_v29, %v773_v27  ;;  %v2349_v42 = vpop.f32.mrb[1].mxu1 }
 0x1d3   : > { %v2350_v11 = vadd.f32 %v2349_v42, %v2348_v34  ;;  %v2351_v53 = vpop.f32.mrb[2].mxu1  ;;  %v1010_v42 = vpop.permute.xlu0 %1009 }
 0x1d4   : > { %v2352_v9 = vpop.f32.mrb[3].mxu1  ;;  %v429_v7 = vpop.permute.xlu1 %428  ;;  %1844 = vmatprep.mubr.bf16.mxu0 %v793_v51 }
 0x1d5   : > { %v2353_v35 = vadd.f32 %v2352_v9, %v2351_v53  ;;  %v486_v0 = vmul.f32 %v582_v20, %v429_v7 }
 0x1d7   : > { %v505_v10 = vpack.c.bf16 %v486_v0, %v485_v18 }
 0x1d9   : > { %v1288_v14 = vpop.permute.xlu1 %1287  ;;  %1845 = vmatmul.mubr.bf16.gmra.mrb[48].mxu0 %v505_v10 }
 0x1da   : > { %v1349_v6 = vmul.f32 %v1288_v14, %v293_v31  ;;  %v1063_v14 = vmul.f32 %v1010_v42, %v3257_v2  ;;  %v587_v42 = vld [vmem:[%s3058_s7 + $0xf0] sm:$0xff] }
 0x1dc   : > { %v1369_v47 = vpack.c.bf16 %v1350_v43, %v1349_v6 }
 0x1de   : > { %v1000_v1 = vpop.permute.xlu1 %999  ;;  %2005 = vmatprep.mubr.bf16.mxu1 %v1369_v47 }
 0x1df   : > { %v1061_v13 = vmul.f32 %v1000_v1, %v293_v31 }
 0x1e2   : > { %v1005_v3 = vpop.permute.xlu1 %1004 }
 0x1e3   : > { %v1062_v38 = vmul.f32 %v1005_v3, %v582_v20 }
 0x1e4   : > { %v2354_v46 = vpop.f32.mrb[4].mxu1 }
 0x1e5   : > { %v1081_v23 = vpack.c.bf16 %v1062_v38, %v1061_v13  ;;  %v2236_v57 = vpop.f32.mrb[0].mxu0  ;;  %v2355_v33 = vpop.f32.mrb[5].mxu1 }
 0x1e6   : > { %v2237_v19 = vpop.f32.mrb[1].mxu0  ;;  %v2356_v17 = vadd.f32 %v2355_v33, %v2354_v46  ;;  %v2357_v5 = vpop.f32.mrb[6].mxu1  ;;  %v586_v46 = vld [vmem:[%s3058_s7 + $0xe8] sm:$0xff] }
 0x1e7   : > { %v2238_v37 = vadd.f32 %v2237_v19, %v2236_v57  ;;  %v2239_v12 = vpop.f32.mrb[2].mxu0  ;;  %v2358_v8 = vpop.f32.mrb[7].mxu1  ;;  %2006 = vmatmul.mubr.bf16.gmra.mrb[48].mxu1 %v1081_v23  ;;  %v1161_v23 = vld [vmem:[%s3058_s7 + $0xe0] sm:$0xff] }
 0x1e8   : > { %v2359_v54 = vadd.f32 %v2358_v8, %v2357_v5  ;;  %v727_v48 = vpop.permute.xlu1 %726  ;;  %v2240_v50 = vpop.f32.mrb[3].mxu0 }
 0x1e9   : > { %v1751_v63 = vadd.f32 %v2238_v37, %v3263_v24  ;;  %v776_v55 = vmul.f32 %v727_v48, %v296_v52  ;;  %v2241_v45 = vadd.f32 %v2240_v50, %v2239_v12 }
 0x1eb   : > { %v1912_v56 = vadd.f32 %v2350_v11, %v1751_v63  ;;  %v794_v49 = vpack.c.bf16 %v776_v55, %v775_v61  ;;  %v1754_v36 = vadd.f32 %v2241_v45, %v3263_v24 }
 0x1ec   : > { %v434_v62 = vpop.permute.xlu1 %433 }
 0x1ed   : > { %2038 = vst [vmem:[%s3272_s12] sm:$0xff] %v1912_v56  ;;  %v1915_v44 = vadd.f32 %v2353_v35, %v1754_v36  ;;  %v487_v40 = vmul.f32 %v3257_v2, %v434_v62  ;;  %v2242_v59 = vpop.f32.mrb[4].mxu0  ;;  %1852 = vmatprep.mubr.bf16.mxu0 %v794_v49  ;;  %v1353_v36 = vmul.f32 %v1308_v30, %v1161_v23 }
 0x1ee   : > { %v2243_v41 = vpop.f32.mrb[5].mxu0 }
 0x1ef   : > { %2039 = vst [vmem:[%s3272_s12 + $0x8] sm:$0xff] %v1915_v44  ;;  %v506_v25 = vpack.c.bf16 %v488_v39, %v487_v40  ;;  %v2244_v15 = vadd.f32 %v2243_v41, %v2242_v59  ;;  %v2245_v21 = vpop.f32.mrb[6].mxu0 }
 0x1f0   : > { %v2246_v26 = vpop.f32.mrb[7].mxu0 }
 0x1f1   : > { %v1759_v16 = vadd.f32 %v2244_v15, %v3263_v24  ;;  %v2247_v4 = vadd.f32 %v2246_v26, %v2245_v21  ;;  %v1298_v60 = vpop.permute.xlu1 %1297  ;;  %1853 = vmatmul.mubr.bf16.gmra.mrb[52].mxu0 %v506_v25  ;;  %v1025_v21 = vpop.permute.xlu0 %1024 }
 0x1f2   : > { %v1351_v27 = vmul.f32 %v1298_v60, %v3257_v2  ;;  %v778_v2 = vmul.f32 %v3253_v58, %v586_v46  ;;  %v1066_v60 = vmul.f32 %v1025_v21, %v586_v46 }
 0x1f3   : > { %v1920_v20 = vadd.f32 %v2356_v17, %v1759_v16  ;;  %v1762_v32 = vadd.f32 %v2247_v4, %v3263_v24 }
 0x1f5   : > { %2040 = vst [vmem:[%s3272_s12 + $0x10] sm:$0xff] %v1920_v20  ;;  %v1923_v29 = vadd.f32 %v2359_v54, %v1762_v32  ;;  %v2248_v31 = vpop.f32.mrb[8].mxu0  ;;  %v1303_v22 = vpop.permute.xlu1 %1302 }
 0x1f6   : > { %v1352_v34 = vmul.f32 %v1303_v22, %v296_v52  ;;  %v2249_v51 = vpop.f32.mrb[9].mxu0 }
 0x1f7   : > { %2041 = vst [vmem:[%s3272_s12 + $0x18] sm:$0xff] %v1923_v29  ;;  %v2250_v11 = vadd.f32 %v2249_v51, %v2248_v31  ;;  %v2251_v53 = vpop.f32.mrb[10].mxu0  ;;  %v2360_v9 = vpop.f32.mrb[8].mxu1 }
 0x1f8   : > { %v1370_v7 = vpack.c.bf16 %v1352_v34, %v1351_v27  ;;  %v2252_v18 = vpop.f32.mrb[11].mxu0  ;;  %v2361_v35 = vpop.f32.mrb[9].mxu1 }
 0x1f9   : > { %v1767_v0 = vadd.f32 %v2250_v11, %v3263_v24  ;;  %v2253_v28 = vadd.f32 %v2252_v18, %v2251_v53  ;;  %v2362_v10 = vadd.f32 %v2361_v35, %v2360_v9  ;;  %v2363_v43 = vpop.f32.mrb[10].mxu1  ;;  %v588_v11 = vld [vmem:[%s3058_s7 + $0xf8] sm:$0xff]  ;;  %v454_v9 = vpop.permute.xlu0 %453 }
 0x1fa   : > { %v2364_v6 = vpop.f32.mrb[11].mxu1  ;;  %v1015_v47 = vpop.permute.xlu1 %1014  ;;  %2013 = vmatprep.mubr.bf16.mxu1 %v1370_v7 }
 0x1fb   : > { %v1770_v1 = vadd.f32 %v2253_v28, %v3263_v24  ;;  %v1928_v3 = vadd.f32 %v2362_v10, %v1767_v0  ;;  %v2365_v13 = vadd.f32 %v2364_v6, %v2363_v43  ;;  %v1064_v38 = vmul.f32 %v1015_v47, %v296_v52 }
 0x1fc   : > { %v491_v6 = vmul.f32 %v587_v42, %v454_v9 }
 0x1fd   : > { %2042 = vst [vmem:[%s3272_s12 + $0x20] sm:$0xff] %v1928_v3  ;;  %v1931_v57 = vadd.f32 %v2365_v13, %v1770_v1  ;;  %v1082_v33 = vpack.c.bf16 %v1064_v38, %v1063_v14  ;;  %v2254_v19 = vpop.f32.mrb[12].mxu0 }
 0x1fe   : > { %v2255_v17 = vpop.f32.mrb[13].mxu0 }
 0x1ff   : > { %2043 = vst [vmem:[%s3272_s12 + $0x28] sm:$0xff] %v1931_v57  ;;  %v2256_v5 = vadd.f32 %v2255_v17, %v2254_v19  ;;  %v732_v61 = vpop.permute.xlu1 %731  ;;  %v2257_v37 = vpop.f32.mrb[14].mxu0  ;;  %2014 = vmatmul.mubr.bf16.gmra.mrb[52].mxu1 %v1082_v33 }
 0x200   : > { %v777_v12 = vmul.f32 %v1161_v23, %v732_v61  ;;  %v2258_v8 = vpop.f32.mrb[15].mxu0 }
 0x201   : > { %v2259_v54 = vadd.f32 %v2258_v8, %v2257_v37  ;;  %v1775_v62 = vadd.f32 %v2256_v5, %v3263_v24 }
 0x202   : > { %v795_v48 = vpack.c.bf16 %v778_v2, %v777_v12 }
 0x203   : > { %v1778_v59 = vadd.f32 %v2259_v54, %v3263_v24 }
 0x204   : > { %v444_v50 = vpop.permute.xlu1 %443  ;;  %1860 = vmatprep.mubr.bf16.mxu0 %v795_v48 }
 0x205   : > { %v489_v63 = vmul.f32 %v1161_v23, %v444_v50 }
 0x208   : > { %v449_v52 = vpop.permute.xlu1 %448 }
 0x209   : > { %v490_v55 = vmul.f32 %v586_v46, %v449_v52 }
 0x20a   : > { %v2366_v45 = vpop.f32.mrb[12].mxu1 }
 0x20b   : > { %v507_v56 = vpack.c.bf16 %v490_v55, %v489_v63  ;;  %v2367_v49 = vpop.f32.mrb[13].mxu1 }
 0x20c   : > { %v2368_v39 = vadd.f32 %v2367_v49, %v2366_v45  ;;  %v2369_v44 = vpop.f32.mrb[14].mxu1 }
 0x20d   : > { %v2370_v58 = vpop.f32.mrb[15].mxu1  ;;  %v1313_v40 = vpop.permute.xlu1 %1312  ;;  %1861 = vmatmul.mubr.bf16.gmra.mrb[56].mxu0 %v507_v56 }
 0x20e   : > { %v1936_v41 = vadd.f32 %v2368_v39, %v1775_v62  ;;  %v2371_v25 = vadd.f32 %v2370_v58, %v2369_v44  ;;  %v1354_v15 = vmul.f32 %v1313_v40, %v586_v46 }
 0x210   : > { %2044 = vst [vmem:[%s3272_s12 + $0x30] sm:$0xff] %v1936_v41  ;;  %v1939_v26 = vadd.f32 %v2371_v25, %v1778_v59  ;;  %v1371_v16 = vpack.c.bf16 %v1354_v15, %v1353_v36  ;;  %v2260_v30 = vpop.f32.mrb[16].mxu0 }
 0x211   : > { %v2261_v4 = vpop.f32.mrb[17].mxu0 }
 0x212   : > { %2045 = vst [vmem:[%s3272_s12 + $0x38] sm:$0xff] %v1939_v26  ;;  %v2262_v20 = vadd.f32 %v2261_v4, %v2260_v30  ;;  %v1020_v32 = vpop.permute.xlu1 %1019  ;;  %v2263_v29 = vpop.f32.mrb[18].mxu0  ;;  %2021 = vmatprep.mubr.bf16.mxu1 %v1371_v16 }
 0x213   : > { %v1065_v31 = vmul.f32 %v1161_v23, %v1020_v32  ;;  %v2264_v22 = vpop.f32.mrb[19].mxu0  ;;  %v1323_v23 = vpop.permute.xlu0 %1322 }
 0x214   : > { %v2265_v27 = vadd.f32 %v2264_v22, %v2263_v29  ;;  %v1783_v10 = vadd.f32 %v2262_v20, %v3263_v24  ;;  %v1356_v5 = vmul.f32 %v1323_v23, %v588_v11 }
 0x215   : > { %v1083_v34 = vpack.c.bf16 %v1066_v60, %v1065_v31 }
 0x216   : > { %v1786_v3 = vadd.f32 %v2265_v27, %v3263_v24 }
 0x217   : > { %v742_v51 = vpop.permute.xlu1 %741  ;;  %2022 = vmatmul.mubr.bf16.gmra.mrb[56].mxu1 %v1083_v34 }
 0x218   : > { %v779_v7 = vmul.f32 %v742_v51, %v587_v42 }
 0x21b   : > { %v747_v53 = vpop.permute.xlu1 %746 }
 0x21c   : > { %v780_v18 = vmul.f32 %v747_v53, %v588_v11 }
 0x21d   : > { %v2372_v35 = vpop.f32.mrb[16].mxu1 }
 0x21e   : > { %v796_v0 = vpack.c.bf16 %v780_v18, %v779_v7  ;;  %v2373_v28 = vpop.f32.mrb[17].mxu1 }
 0x21f   : > { %v2374_v43 = vadd.f32 %v2373_v28, %v2372_v35  ;;  %v2375_v14 = vpop.f32.mrb[18].mxu1 }
 0x220   : > { %v2376_v47 = vpop.f32.mrb[19].mxu1  ;;  %v459_v1 = vpop.permute.xlu1 %458  ;;  %1868 = vmatprep.mubr.bf16.mxu0 %v796_v0 }
 0x221   : > { %v1944_v13 = vadd.f32 %v2374_v43, %v1783_v10  ;;  %v2377_v38 = vadd.f32 %v2376_v47, %v2375_v14  ;;  %v492_v46 = vmul.f32 %v588_v11, %v459_v1 }
 0x223   : > { %2046 = vst [vmem:[%s3272_s12 + $0x40] sm:$0xff] %v1944_v13  ;;  %v1947_v57 = vadd.f32 %v2377_v38, %v1786_v3  ;;  %v508_v33 = vpack.c.bf16 %v492_v46, %v491_v6  ;;  %v2266_v19 = vpop.f32.mrb[20].mxu0 }
 0x224   : > { %v2267_v17 = vpop.f32.mrb[21].mxu0 }
 0x225   : > { %2047 = vst [vmem:[%s3272_s12 + $0x48] sm:$0xff] %v1947_v57  ;;  %v2268_v61 = vadd.f32 %v2267_v17, %v2266_v19  ;;  %v1318_v37 = vpop.permute.xlu1 %1317  ;;  %v2269_v2 = vpop.f32.mrb[22].mxu0  ;;  %1869 = vmatmul.mubr.bf16.gmra.mrb[60].mxu0 %v508_v33 }
 0x226   : > { %v1355_v12 = vmul.f32 %v1318_v37, %v587_v42  ;;  %v2270_v8 = vpop.f32.mrb[23].mxu0 }
 0x227   : > { %v2271_v54 = vadd.f32 %v2270_v8, %v2269_v2  ;;  %v1791_v36 = vadd.f32 %v2268_v61, %v3263_v24 }
 0x228   : > { %v1372_v48 = vpack.c.bf16 %v1356_v5, %v1355_v12 }
 0x229   : > { %v1794_v58 = vadd.f32 %v2271_v54, %v3263_v24 }
 0x22a   : > { %v1030_v50 = vpop.permute.xlu1 %1029  ;;  %2029 = vmatprep.mubr.bf16.mxu1 %v1372_v48 }
 0x22b   : > { %v1067_v63 = vmul.f32 %v1030_v50, %v587_v42 }
 0x22e   : > { %v1035_v52 = vpop.permute.xlu1 %1034 }
 0x22f   : > { %v1068_v55 = vmul.f32 %v1035_v52, %v588_v11 }
 0x230   : > { %v2378_v45 = vpop.f32.mrb[20].mxu1 }
 0x231   : > { %v1084_v56 = vpack.c.bf16 %v1068_v55, %v1067_v63  ;;  %v2379_v49 = vpop.f32.mrb[21].mxu1 }
 0x232   : > { %v2380_v62 = vadd.f32 %v2379_v49, %v2378_v45  ;;  %v2381_v39 = vpop.f32.mrb[22].mxu1 }
 0x233   : > { %v2382_v44 = vpop.f32.mrb[23].mxu1  ;;  %2030 = vmatmul.mubr.bf16.gmra.mrb[60].mxu1 %v1084_v56 }
 0x234   : > { %v1952_v40 = vadd.f32 %v2380_v62, %v1791_v36  ;;  %v2383_v59 = vadd.f32 %v2382_v44, %v2381_v39 }
 0x236   : > { %2048 = vst [vmem:[%s3272_s12 + $0x50] sm:$0xff] %v1952_v40  ;;  %v1955_v41 = vadd.f32 %v2383_v59, %v1794_v58  ;;  %v2272_v25 = vpop.f32.mrb[24].mxu0 }
 0x237   : > { %v2273_v15 = vpop.f32.mrb[25].mxu0 }
 0x238   : > { %2049 = vst [vmem:[%s3272_s12 + $0x58] sm:$0xff] %v1955_v41  ;;  %v2274_v21 = vadd.f32 %v2273_v15, %v2272_v25  ;;  %v2275_v26 = vpop.f32.mrb[26].mxu0 }
 0x239   : > { %v2276_v16 = vpop.f32.mrb[27].mxu0 }
 0x23a   : > { %v2277_v30 = vadd.f32 %v2276_v16, %v2275_v26  ;;  %v1799_v20 = vadd.f32 %v2274_v21, %v3263_v24 }
 0x23c   : > { %v1802_v22 = vadd.f32 %v2277_v30, %v3263_v24 }
 0x243   : > { %v2384_v4 = vpop.f32.mrb[24].mxu1 }
 0x244   : > { %v2385_v60 = vpop.f32.mrb[25].mxu1 }
 0x245   : > { %v2386_v32 = vadd.f32 %v2385_v60, %v2384_v4  ;;  %v2387_v29 = vpop.f32.mrb[26].mxu1 }
 0x246   : > { %v2388_v31 = vpop.f32.mrb[27].mxu1 }
 0x247   : > { %v1960_v27 = vadd.f32 %v2386_v32, %v1799_v20  ;;  %v2389_v34 = vadd.f32 %v2388_v31, %v2387_v29 }
 0x249   : > { %2050 = vst [vmem:[%s3272_s12 + $0x60] sm:$0xff] %v1960_v27  ;;  %v1963_v51 = vadd.f32 %v2389_v34, %v1802_v22  ;;  %v2278_v42 = vpop.f32.mrb[28].mxu0 }
 0x24a   : > { %v2279_v11 = vpop.f32.mrb[29].mxu0 }
 0x24b   : > { %2051 = vst [vmem:[%s3272_s12 + $0x68] sm:$0xff] %v1963_v51  ;;  %v2280_v53 = vadd.f32 %v2279_v11, %v2278_v42  ;;  %v2281_v9 = vpop.f32.mrb[30].mxu0 }
 0x24c   : > { %v2282_v7 = vpop.f32.mrb[31].mxu0 }
 0x24d   : > { %v2283_v18 = vadd.f32 %v2282_v7, %v2281_v9  ;;  %v1807_v28 = vadd.f32 %v2280_v53, %v3263_v24 }
 0x24f   : > { %v1810_v6 = vadd.f32 %v2283_v18, %v3263_v24 }
 0x256   : > { %v2390_v35 = vpop.f32.mrb[28].mxu1 }
 0x257   : > { %v2391_v0 = vpop.f32.mrb[29].mxu1 }
 0x258   : > { %v2392_v10 = vadd.f32 %v2391_v0, %v2390_v35  ;;  %v2393_v43 = vpop.f32.mrb[30].mxu1 }
 0x259   : > { %v2394_v14 = vpop.f32.mrb[31].mxu1 }
 0x25a   : > { %v1968_v47 = vadd.f32 %v2392_v10, %v1807_v28  ;;  %v2395_v1 = vadd.f32 %v2394_v14, %v2393_v43 }
 0x25c   : > { %2052 = vst [vmem:[%s3272_s12 + $0x70] sm:$0xff] %v1968_v47  ;;  %v1971_v3 = vadd.f32 %v2395_v1, %v1810_v6  ;;  %v2284_v13 = vpop.f32.mrb[32].mxu0 }
 0x25d   : > { %v2285_v38 = vpop.f32.mrb[33].mxu0 }
 0x25e   : > { %2053 = vst [vmem:[%s3272_s12 + $0x78] sm:$0xff] %v1971_v3  ;;  %v2286_v46 = vadd.f32 %v2285_v38, %v2284_v13  ;;  %v2287_v23 = vpop.f32.mrb[34].mxu0 }
 0x25f   : > { %v2288_v57 = vpop.f32.mrb[35].mxu0 }
 0x260   : > { %v2289_v33 = vadd.f32 %v2288_v57, %v2287_v23  ;;  %v1815_v5 = vadd.f32 %v2286_v46, %v3263_v24 }
 0x262   : > { %v1818_v12 = vadd.f32 %v2289_v33, %v3263_v24 }
 0x269   : > { %v2396_v19 = vpop.f32.mrb[32].mxu1 }
 0x26a   : > { %v2397_v17 = vpop.f32.mrb[33].mxu1 }
 0x26b   : > { %v2398_v61 = vadd.f32 %v2397_v17, %v2396_v19  ;;  %v2399_v37 = vpop.f32.mrb[34].mxu1 }
 0x26c   : > { %v2400_v2 = vpop.f32.mrb[35].mxu1 }
 0x26d   : > { %v1976_v8 = vadd.f32 %v2398_v61, %v1815_v5  ;;  %v2401_v54 = vadd.f32 %v2400_v2, %v2399_v37 }
 0x26f   : > { %2054 = vst [vmem:[%s3272_s12 + $0x80] sm:$0xff] %v1976_v8  ;;  %v1979_v48 = vadd.f32 %v2401_v54, %v1818_v12  ;;  %v2290_v50 = vpop.f32.mrb[36].mxu0 }
 0x270   : > { %v2291_v52 = vpop.f32.mrb[37].mxu0 }
 0x271   : > { %2055 = vst [vmem:[%s3272_s12 + $0x88] sm:$0xff] %v1979_v48  ;;  %v2292_v63 = vadd.f32 %v2291_v52, %v2290_v50  ;;  %v2293_v55 = vpop.f32.mrb[38].mxu0 }
 0x272   : > { %v2294_v45 = vpop.f32.mrb[39].mxu0 }
 0x273   : > { %v2295_v56 = vadd.f32 %v2294_v45, %v2293_v55  ;;  %v1823_v62 = vadd.f32 %v2292_v63, %v3263_v24 }
 0x275   : > { %v1826_v40 = vadd.f32 %v2295_v56, %v3263_v24 }
 0x27c   : > { %v2402_v49 = vpop.f32.mrb[36].mxu1 }
 0x27d   : > { %v2403_v36 = vpop.f32.mrb[37].mxu1 }
 0x27e   : > { %v2404_v39 = vadd.f32 %v2403_v36, %v2402_v49  ;;  %v2405_v44 = vpop.f32.mrb[38].mxu1 }
 0x27f   : > { %v2406_v58 = vpop.f32.mrb[39].mxu1 }
 0x280   : > { %v1984_v59 = vadd.f32 %v2404_v39, %v1823_v62  ;;  %v2407_v41 = vadd.f32 %v2406_v58, %v2405_v44 }
 0x282   : > { %2056 = vst [vmem:[%s3272_s12 + $0x90] sm:$0xff] %v1984_v59  ;;  %v1987_v25 = vadd.f32 %v2407_v41, %v1826_v40  ;;  %v2296_v15 = vpop.f32.mrb[40].mxu0 }
 0x283   : > { %v2297_v21 = vpop.f32.mrb[41].mxu0 }
 0x284   : > { %2057 = vst [vmem:[%s3272_s12 + $0x98] sm:$0xff] %v1987_v25  ;;  %v2298_v26 = vadd.f32 %v2297_v21, %v2296_v15  ;;  %v2299_v16 = vpop.f32.mrb[42].mxu0 }
 0x285   : > { %v2300_v30 = vpop.f32.mrb[43].mxu0 }
 0x286   : > { %v2301_v4 = vadd.f32 %v2300_v30, %v2299_v16  ;;  %v1831_v32 = vadd.f32 %v2298_v26, %v3263_v24 }
 0x288   : > { %v1834_v27 = vadd.f32 %v2301_v4, %v3263_v24 }
 0x28f   : > { %v2408_v60 = vpop.f32.mrb[40].mxu1 }
 0x290   : > { %v2409_v20 = vpop.f32.mrb[41].mxu1 }
 0x291   : > { %v2410_v29 = vadd.f32 %v2409_v20, %v2408_v60  ;;  %v2411_v31 = vpop.f32.mrb[42].mxu1 }
 0x292   : > { %v2412_v22 = vpop.f32.mrb[43].mxu1 }
 0x293   : > { %v1992_v34 = vadd.f32 %v2410_v29, %v1831_v32  ;;  %v2413_v51 = vadd.f32 %v2412_v22, %v2411_v31 }
 0x295   : > { %2058 = vst [vmem:[%s3272_s12 + $0xa0] sm:$0xff] %v1992_v34  ;;  %v1995_v42 = vadd.f32 %v2413_v51, %v1834_v27  ;;  %v2302_v11 = vpop.f32.mrb[44].mxu0 }
 0x296   : > { %v2303_v53 = vpop.f32.mrb[45].mxu0 }
 0x297   : > { %2059 = vst [vmem:[%s3272_s12 + $0xa8] sm:$0xff] %v1995_v42  ;;  %v2304_v9 = vadd.f32 %v2303_v53, %v2302_v11  ;;  %v2305_v7 = vpop.f32.mrb[46].mxu0 }
 0x298   : > { %v2306_v18 = vpop.f32.mrb[47].mxu0 }
 0x299   : > { %v2307_v35 = vadd.f32 %v2306_v18, %v2305_v7  ;;  %v1839_v10 = vadd.f32 %v2304_v9, %v3263_v24 }
 0x29b   : > { %v1842_v47 = vadd.f32 %v2307_v35, %v3263_v24 }
 0x2a2   : > { %v2414_v0 = vpop.f32.mrb[44].mxu1 }
 0x2a3   : > { %v2415_v28 = vpop.f32.mrb[45].mxu1 }
 0x2a4   : > { %v2416_v43 = vadd.f32 %v2415_v28, %v2414_v0  ;;  %v2417_v14 = vpop.f32.mrb[46].mxu1 }
 0x2a5   : > { %v2418_v6 = vpop.f32.mrb[47].mxu1 }
 0x2a6   : > { %v2000_v1 = vadd.f32 %v2416_v43, %v1839_v10  ;;  %v2419_v3 = vadd.f32 %v2418_v6, %v2417_v14 }
 0x2a8   : > { %2060 = vst [vmem:[%s3272_s12 + $0xb0] sm:$0xff] %v2000_v1  ;;  %v2003_v13 = vadd.f32 %v2419_v3, %v1842_v47 }
 0x2aa   : > { %2061 = vst [vmem:[%s3272_s12 + $0xb8] sm:$0xff] %v2003_v13 }
 0x2ac   : > { %v2308_v38 = vpop.f32.mrb[48].mxu0 }
 0x2ad   : > { %v2309_v46 = vpop.f32.mrb[49].mxu0 }
 0x2ae   : > { %v2310_v23 = vadd.f32 %v2309_v46, %v2308_v38  ;;  %v2311_v57 = vpop.f32.mrb[50].mxu0 }
 0x2af   : > { %v2312_v33 = vpop.f32.mrb[51].mxu0 }
 0x2b0   : > { %v2313_v19 = vadd.f32 %v2312_v33, %v2311_v57  ;;  %v1847_v61 = vadd.f32 %v2310_v23, %v3263_v24 }
 0x2b2   : > { %v1850_v8 = vadd.f32 %v2313_v19, %v3263_v24 }
 0x2ba   : > { %v2420_v17 = vpop.f32.mrb[48].mxu1 }
 0x2bb   : > { %v2421_v5 = vpop.f32.mrb[49].mxu1 }
 0x2bc   : > { %v2422_v37 = vadd.f32 %v2421_v5, %v2420_v17  ;;  %v2423_v2 = vpop.f32.mrb[50].mxu1 }
 0x2bd   : > { %v2424_v12 = vpop.f32.mrb[51].mxu1 }
 0x2be   : > { %v2008_v54 = vadd.f32 %v2422_v37, %v1847_v61  ;;  %v2425_v48 = vadd.f32 %v2424_v12, %v2423_v2 }
 0x2c0   : > { %2062 = vst [vmem:[%s3272_s12 + $0xc0] sm:$0xff] %v2008_v54  ;;  %v2011_v50 = vadd.f32 %v2425_v48, %v1850_v8 }
 0x2c2   : > { %2063 = vst [vmem:[%s3272_s12 + $0xc8] sm:$0xff] %v2011_v50 }
 0x2c4   : > { %v2314_v52 = vpop.f32.mrb[52].mxu0 }
 0x2c5   : > { %v2315_v63 = vpop.f32.mrb[53].mxu0 }
 0x2c6   : > { %v2316_v55 = vadd.f32 %v2315_v63, %v2314_v52  ;;  %v2317_v45 = vpop.f32.mrb[54].mxu0 }
 0x2c7   : > { %v2318_v56 = vpop.f32.mrb[55].mxu0 }
 0x2c8   : > { %v2319_v49 = vadd.f32 %v2318_v56, %v2317_v45  ;;  %v1855_v39 = vadd.f32 %v2316_v55, %v3263_v24 }
 0x2ca   : > { %v1858_v59 = vadd.f32 %v2319_v49, %v3263_v24 }
 0x2d2   : > { %v2426_v36 = vpop.f32.mrb[52].mxu1 }
 0x2d3   : > { %v2427_v62 = vpop.f32.mrb[53].mxu1 }
 0x2d4   : > { %v2428_v44 = vadd.f32 %v2427_v62, %v2426_v36  ;;  %v2429_v58 = vpop.f32.mrb[54].mxu1 }
 0x2d5   : > { %v2430_v40 = vpop.f32.mrb[55].mxu1 }
 0x2d6   : > { %v2016_v41 = vadd.f32 %v2428_v44, %v1855_v39  ;;  %v2431_v25 = vadd.f32 %v2430_v40, %v2429_v58 }
 0x2d8   : > { %2064 = vst [vmem:[%s3272_s12 + $0xd0] sm:$0xff] %v2016_v41  ;;  %v2019_v15 = vadd.f32 %v2431_v25, %v1858_v59 }
 0x2da   : > { %2065 = vst [vmem:[%s3272_s12 + $0xd8] sm:$0xff] %v2019_v15 }
 0x2e0   : > { %v2320_v21 = vpop.f32.mrb[56].mxu0 }
 0x2e1   : > { %v2321_v26 = vpop.f32.mrb[57].mxu0 }
 0x2e2   : > { %v2322_v16 = vadd.f32 %v2321_v26, %v2320_v21  ;;  %v2323_v30 = vpop.f32.mrb[58].mxu0 }
 0x2e3   : > { %v2324_v4 = vpop.f32.mrb[59].mxu0 }
 0x2e4   : > { %v2325_v60 = vadd.f32 %v2324_v4, %v2323_v30  ;;  %v1863_v29 = vadd.f32 %v2322_v16, %v3263_v24 }
 0x2e6   : > { %v1866_v34 = vadd.f32 %v2325_v60, %v3263_v24 }
 0x2ea   : > { %v2432_v20 = vpop.f32.mrb[56].mxu1 }
 0x2eb   : > { %v2433_v32 = vpop.f32.mrb[57].mxu1 }
 0x2ec   : > { %v2434_v31 = vadd.f32 %v2433_v32, %v2432_v20  ;;  %v2435_v22 = vpop.f32.mrb[58].mxu1 }
 0x2ed   : > { %v2436_v27 = vpop.f32.mrb[59].mxu1 }
 0x2ee   : > { %v2024_v51 = vadd.f32 %v2434_v31, %v1863_v29  ;;  %v2437_v42 = vadd.f32 %v2436_v27, %v2435_v22 }
 0x2f0   : > { %2066 = vst [vmem:[%s3272_s12 + $0xe0] sm:$0xff] %v2024_v51  ;;  %v2027_v11 = vadd.f32 %v2437_v42, %v1866_v34 }
 0x2f2   : > { %2067 = vst [vmem:[%s3272_s12 + $0xe8] sm:$0xff] %v2027_v11 }
 0x2f8   : > { %v2326_v53 = vpop.f32.mrb[60].mxu0 }
 0x2f9   : > { %v2327_v9 = vpop.f32.mrb[61].mxu0 }
 0x2fa   : > { %v2328_v7 = vadd.f32 %v2327_v9, %v2326_v53  ;;  %v2329_v18 = vpop.f32.mrb[62].mxu0 }
 0x2fb   : > { %v2330_v35 = vpop.f32.mrb[63].mxu0 }
 0x2fc   : > { %v2331_v0 = vadd.f32 %v2330_v35, %v2329_v18  ;;  %v1871_v43 = vadd.f32 %v2328_v7, %v3263_v24 }
 0x2fe   : > { %v1874_v1 = vadd.f32 %v2331_v0, %v3263_v24 }
 0x306   : > { %v2438_v28 = vpop.f32.mrb[60].mxu1 }
 0x307   : > { %v2439_v10 = vpop.f32.mrb[61].mxu1 }
 0x308   : > { %v2440_v14 = vadd.f32 %v2439_v10, %v2438_v28  ;;  %v2441_v6 = vpop.f32.mrb[62].mxu1 }
 0x309   : > { %v2442_v47 = vpop.f32.mrb[63].mxu1 }
 0x30a   : > { %v2032_v3 = vadd.f32 %v2440_v14, %v1871_v43  ;;  %v2443_v13 = vadd.f32 %v2442_v47, %v2441_v6 }
 0x30c   : > { %2068 = vst [vmem:[%s3272_s12 + $0xf0] sm:$0xff] %v2032_v3  ;;  %v2035_v38 = vadd.f32 %v2443_v13, %v1874_v1 }
 0x30e   : > { %2069 = vst [vmem:[%s3272_s12 + $0xf8] sm:$0xff] %v2035_v38 }
 0x30f   : > { %2636 = shalt.err (!%p2633_p7)
}
 0x310   : > { %s2637_s5 = scalar_lea.hbm %s3347_s23, 4096  ;;  %s2641_s8 = scalar_lea.hbm %s3400_s4, 8192 }
 0x311   : > { %p2638_p8 = scmp.ne.s32.totalorder %s3347_s23, %s2637_s5  ;;  %p2642_p1 = scmp.lt.u32.totalorder %s3347_s23, %s3400_s4 }
 0x312   : > { %p2643_p0 = scmp.lt.u32.totalorder %s2641_s8, %s2637_s5  ;;  %p2645_p6 = scmp.lt.u32.totalorder %s2637_s5, %s3347_s23 }
 0x313   : > { %p2639_p11 = pnand %p2638_p8, %p3414_p9 }
 0x314   : > { %p2644_p5 = por %p2643_p0, %p2642_p1 }
 0x315   : > { %p2640_p13 = pneg %p2639_p11 }
 0x316   : > { %p2646_p10 = por %p2645_p6, %p2644_p5 }
 0x318   : > { %p2647_p12 = pnand %p2646_p10, %p2640_p13 }
 0x31a   : > { %2650 = shalt.err (!%p2647_p12)
}
 0x31b   : > { %s2699_s11 = smov 128   ;;  %s2700_s12 = smov 8  }
 0x31c   : > { %2448 = dma.vmem_to_hbm [thread:$0]  (%p3414_p9), %s3349_s14, 4096, %s3347_s23, %s3355_s19, %s2699_s11, %s2699_s11, %s2700_s12  }
 0x31d PF: > { %p2460_p2 = scmp.ge.s32.totalorder %s2689_s18, 2  ;;  %s2099_s13 = sand.u32 1, %s2677_s15  }
 0x31e   : > { %p3415_p3 = scmp.ne.s32.totalorder %s3407_s26, 0  ;;  %s2100_s20 = scalar_lea.sflag [#allocation5], %s2099_s13 }
 0x320   : > { %p2455_p4 = pnand %p2460_p2, %p3415_p3 }
 0x322   : > { %2672 = dma.done.wait (!%p2455_p4), %s2100_s20, 4096  }
 0x323   : > { %2674 = vsyncadd (!%p2455_p4), %s2100_s20, 4294963200  ;;  %p15_p7 = scmp.ge.s32.totalorder %s2751_s21, 4   ;;  %s3416_s15 = smov %s2681_s16 }
 0x324   : > { %s3417_s16 = smov %s2685_s17  ;;  %s3418_s17 = smov %s2762_s24 }
 0x325   : > { %s3419_s18 = smov %s2751_s21  ;;  %17 = sbr.rel (!%p15_p7) target bundleno = 4 (0x4), region = 79 }
 0x32c   :  { %2105 = vsyncpa [#allocation4], 1 }
 0x32d   :  { %2107 = vsyncpa [#allocation4 + $0x1], 1 }
 0x32e   :  { %2108 = vsyncpa [#allocation5], 1 }
 0x32f   :  { %2110 = vsyncpa [#allocation5 + $0x1], 1 }

</bundles_post_ra>
